<compile_context>
chip_gen: v6e
topology: v6e:2x2x1
jax: 0.10.0
libtpu: 0.0.40
codegen_flags: <defaults>
</compile_context>

<pallas_src>
import jax
import jax.numpy as jnp
from jax import lax
from jax.experimental import pallas as pl
from jax.experimental.pallas import tpu as pltpu

NUM_CLASSES = 10          # original script reads args.num_classes (never defined); fixed to 10.
LANES = 128               # TPU lane width; all GEMM N/K dims padded to multiples of this.
MATMUL_DTYPE = jnp.bfloat16  # MXU input dtype (accumulation stays f32 in-kernel).


def _round_up(x, m):
    return (x + m - 1) // m * m


# ---------------- Kernel 1: im2col-GEMM + bias + fused 2x2 maxpool ----------------
def _conv_pool_kernel(p_ref, w_ref, b_ref, o_ref):
    # p_ref: (4, TM, Kp)  -- axis 0 = the 4 positions of each 2x2 pool window
    # w_ref: (Kp, 128)    -- conv weight, Cout lane-padded to 128 (bf16)
    # b_ref: (1, 128)     -- bias, lane-padded (f32)
    # o_ref: (TM, 128)    -- pooled conv output (channels-last, lane-padded, f32)
    w = w_ref[...]
    y0 = jnp.dot(p_ref[0], w, preferred_element_type=jnp.float32)
    y1 = jnp.dot(p_ref[1], w, preferred_element_type=jnp.float32)
    y2 = jnp.dot(p_ref[2], w, preferred_element_type=jnp.float32)
    y3 = jnp.dot(p_ref[3], w, preferred_element_type=jnp.float32)
    pooled = jnp.maximum(jnp.maximum(y0, y1), jnp.maximum(y2, y3))
    o_ref[...] = pooled + b_ref[...]


def conv_pool_gemm(p4, w, b, tm):
    # p4: [4, Mp, Kp] bf16; w: [Kp, 128] bf16; b: [1, 128] f32
    _, mp, kp = p4.shape
    return pl.pallas_call(
        _conv_pool_kernel,
        out_shape=jax.ShapeDtypeStruct((mp, LANES), jnp.float32),
        grid=(mp // tm,),
        in_specs=[
            pl.BlockSpec((4, tm, kp), lambda i: (0, i, 0)),
            pl.BlockSpec((kp, LANES), lambda i: (0, 0)),
            pl.BlockSpec((1, LANES), lambda i: (0, 0)),
        ],
        out_specs=pl.BlockSpec((tm, LANES), lambda i: (i, 0)),
        compiler_params=pltpu.CompilerParams(dimension_semantics=("parallel",)),
    )(p4, w, b)


# ---------------- Kernel 2: fused FC stack (fc1 -> fc2 -> fc3) ----------------
def _fc_kernel(x_ref, w1_ref, b1_ref, w2_ref, b2_ref, w3_ref, b3_ref, o_ref):
    h = jnp.dot(x_ref[...], w1_ref[...],
                preferred_element_type=jnp.float32) + b1_ref[...]
    h = jnp.dot(h.astype(w2_ref.dtype), w2_ref[...],
                preferred_element_type=jnp.float32) + b2_ref[...]
    o_ref[...] = jnp.dot(h.astype(w3_ref.dtype), w3_ref[...],
                         preferred_element_type=jnp.float32) + b3_ref[...]


def fc_stack(x, w1, b1, w2, b2, w3, b3, tb):
    bp, kp = x.shape
    bias_spec = pl.BlockSpec((1, LANES), lambda i: (0, 0))
    return pl.pallas_call(
        _fc_kernel,
        out_shape=jax.ShapeDtypeStruct((bp, LANES), jnp.float32),
        grid=(bp // tb,),
        in_specs=[
            pl.BlockSpec((tb, kp), lambda i: (i, 0)),
            pl.BlockSpec(w1.shape, lambda i: (0, 0)),
            bias_spec,
            pl.BlockSpec(w2.shape, lambda i: (0, 0)),
            bias_spec,
            pl.BlockSpec(w3.shape, lambda i: (0, 0)),
            bias_spec,
        ],
        out_specs=pl.BlockSpec((tb, LANES), lambda i: (i, 0)),
        compiler_params=pltpu.CompilerParams(dimension_semantics=("parallel",)),
    )(x, w1, b1, w2, b2, w3, b3)


# ---------------- Glue: patch extraction + padding (tiny, plain JAX) ----------------
def _pool_window_patches(pat_nhwc):
    # pat_nhwc: [B, 2*PH, 2*PW, K] im2col patches (K ordered (Cin, KH, KW)).
    # Returns ([4, Mp, Kp] bf16, tm): axis 0 enumerates the 2x2 pool-window
    # positions, rows are (b, ph, pw) pooled-output pixels padded to Mp,
    # K zero-padded to a multiple of 128.
    b, h2, w2, k = pat_nhwc.shape
    ph, pw = h2 // 2, w2 // 2
    p = pat_nhwc.reshape(b, ph, 2, pw, 2, k)
    p = p.transpose(2, 4, 0, 1, 3, 5).reshape(4, b * ph * pw, k)
    m = b * ph * pw
    tm = min(128, _round_up(m, 8))
    mp = _round_up(m, tm)
    kp = _round_up(k, LANES)
    p = jnp.pad(p, ((0, 0), (0, mp - m), (0, kp - k)))
    return p.astype(MATMUL_DTYPE), tm


def _pad_gemm_params(w2d, bias):
    # w2d: [K, N] -> [round_up(K,128), 128] bf16 ; bias: [N] -> [1, 128] f32.
    k, n = w2d.shape
    w = jnp.pad(w2d, ((0, _round_up(k, LANES) - k), (0, LANES - n)))
    b = jnp.pad(bias.reshape(1, n), ((0, 0), (0, LANES - n)))
    return w.astype(MATMUL_DTYPE), b.astype(jnp.float32)


def conv_pool(x, w, bias, padding, dn):
    # Fused Conv2d(stride=1, padding) + MaxPool2d(2,2).
    # x: layout per `dn`; w: [Cout, Cin, KH, KW] (torch layout); bias: [Cout].
    # Returns channels-last, lane-padded activation [B, OH/2, OW/2, 128] (f32).
    cout, cin, kh, kw = w.shape
    pat = lax.conv_general_dilated_patches(
        x, filter_shape=(kh, kw), window_strides=(1, 1),
        padding=((padding, padding), (padding, padding)),
        dimension_numbers=dn)                       # [B, OH, OW, Cin*KH*KW]
    p4, tm = _pool_window_patches(pat)
    w2d, b2d = _pad_gemm_params(w.reshape(cout, cin * kh * kw).T, bias)
    out = conv_pool_gemm(p4, w2d, b2d, tm)          # [Mp, 128]
    b_sz, oh, ow = x.shape[0], pat.shape[1] // 2, pat.shape[2] // 2
    return out[: b_sz * oh * ow].reshape(b_sz, oh, ow, LANES)


# ---------------- Parameters & forward ----------------
def init_params(key, num_classes=NUM_CLASSES):
    ks = jax.random.split(key, 10)

    def u(k, shape, fan_in):
        bound = 1.0 / (fan_in ** 0.5)
        return jax.random.uniform(k, shape, jnp.float32, -bound, bound)

    return dict(
        conv1_w=u(ks[0], (6, 1, 3, 3), 1 * 3 * 3),
        conv1_b=u(ks[1], (6,), 1 * 3 * 3),
        conv2_w=u(ks[2], (16, 6, 5, 5), 6 * 5 * 5),
        conv2_b=u(ks[3], (16,), 6 * 5 * 5),
        fc1_w=u(ks[4], (400, 120), 400),
        fc1_b=u(ks[5], (120,), 400),
        fc2_w=u(ks[6], (120, 84), 120),
        fc2_b=u(ks[7], (84,), 120),
        fc3_w=u(ks[8], (84, num_classes), 84),
        fc3_b=u(ks[9], (num_classes,), 84),
    )


def lenet_forward(x, p, num_classes=NUM_CLASSES):
    b = x.shape[0]

    # conv1 + pool1 (NCHW input -> channels-last, lane-padded output)
    y1 = conv_pool(x, p["conv1_w"], p["conv1_b"], padding=1,
                   dn=("NCHW", "OIHW", "NHWC"))              # [B, 14, 14, 128]
    y1 = y1[..., :6]                                          # [B, 14, 14, 6] NHWC

    # conv2 + pool2 (stays channels-last; keep the 128-lane padding)
    y2 = conv_pool(y1, p["conv2_w"], p["conv2_b"], padding=0,
                   dn=("NHWC", "HWIO", "NHWC"))              # [B, 5, 5, 128]

    # Flatten. Torch does an NCHW .view -> feature index c*25 + h*5 + w.
    # Our activation index is (h*5 + w)*128 + c (channels-last, lane-padded);
    # fold that permutation into fc1's weight rows instead of transposing.
    x_fc = y2.reshape(b, 5 * 5 * LANES).astype(MATMUL_DTYPE)  # [B, 3200]

    w1 = p["fc1_w"].reshape(16, 25, 120).transpose(1, 0, 2)   # [hw, c, out]
    w1 = jnp.pad(w1, ((0, 0), (0, LANES - 16), (0, LANES - 120)))
    w1 = w1.reshape(25 * LANES, LANES).astype(MATMUL_DTYPE)   # [3200, 128]
    b1 = jnp.pad(p["fc1_b"].reshape(1, 120),
                 ((0, 0), (0, LANES - 120))).astype(jnp.float32)

    w2, b2 = _pad_gemm_params(p["fc2_w"], p["fc2_b"])         # [128,128], [1,128]
    w3, b3 = _pad_gemm_params(p["fc3_w"], p["fc3_b"])         # [128,128], [1,128]

    tb = min(128, _round_up(b, 8))
    bp = _round_up(b, tb)
    x_fc = jnp.pad(x_fc, ((0, bp - b), (0, 0)))

    logits = fc_stack(x_fc, w1, b1, w2, b2, w3, b3, tb)       # [Bp, 128]
    return logits[:b, :num_classes]


if __name__ == "__main__":
    key = jax.random.PRNGKey(0)
    kx, kp = jax.random.split(key)
    # LeNet geometry requires 28x28 single-channel input (16*5*5 == 400).
    x = jax.random.normal(kx, (2, 1, 28, 28), dtype=jnp.float32)
    params = init_params(kp)

    fwd = jax.jit(lenet_forward)
    out = fwd(x, params)
    out = jax.block_until_ready(out)

    assert out.shape == (2, NUM_CLASSES), out.shape
    assert out.dtype == jnp.float32
    print("KERNEL_OK")
</pallas_src>

<mosaic_0001>
module attributes {stable_mosaic.version = 11 : i64} {
  func.func @_conv_pool_kernel(%arg0: i32, %arg1: memref<4x128x128xbf16, #tpu.memory_space<vmem>>, %arg2: memref<128x128xbf16, #tpu.memory_space<vmem>>, %arg3: memref<1x128xf32, #tpu.memory_space<vmem>>, %arg4: memref<128x128xf32, #tpu.memory_space<vmem>>) attributes {dimension_semantics = [#tpu.dimension_semantics<parallel>], iteration_bounds = array<i64: 4>, scalar_prefetch = 0 : i64, scratch_operands = 0 : i64, tpu.core_type = #tpu.core_type<tc>, window_params = [{transform_indices = @transform_0, window_bounds = array<i64: 4, 128, 128>}, {pipeline_mode = #tpu.pipeline_mode<synchronous>, transform_indices = @transform_1, window_bounds = array<i64: 128, 128>}, {pipeline_mode = #tpu.pipeline_mode<synchronous>, transform_indices = @transform_2, window_bounds = array<i64: 1, 128>}, {transform_indices = @transform_3, window_bounds = array<i64: 128, 128>}]} {
    %c0 = arith.constant 0 : index
    %c0_0 = arith.constant 0 : index
    %0 = vector.load %arg2[%c0, %c0_0] : memref<128x128xbf16, #tpu.memory_space<vmem>>, vector<128x128xbf16>
    %c0_1 = arith.constant 0 : index
    %c0_2 = arith.constant 0 : index
    %c0_3 = arith.constant 0 : index
    %1 = vector.load %arg1[%c0_1, %c0_2, %c0_3] : memref<4x128x128xbf16, #tpu.memory_space<vmem>>, vector<1x128x128xbf16>
    %2 = vector.shape_cast %1 : vector<1x128x128xbf16> to vector<128x128xbf16>
    %cst = arith.constant dense<0.000000e+00> : vector<128x128xf32>
    %3 = tpu.matmul %2, %0, %cst {dimension_numbers = #tpu.dot_dimension_numbers<[1], [0], [0], [1], [0, 0, 1, 1], [], []>} : vector<128x128xbf16>, vector<128x128xbf16>, vector<128x128xf32> -> vector<128x128xf32>
    %c1 = arith.constant 1 : index
    %c0_4 = arith.constant 0 : index
    %c0_5 = arith.constant 0 : index
    %4 = vector.load %arg1[%c1, %c0_4, %c0_5] : memref<4x128x128xbf16, #tpu.memory_space<vmem>>, vector<1x128x128xbf16>
    %5 = vector.shape_cast %4 : vector<1x128x128xbf16> to vector<128x128xbf16>
    %cst_6 = arith.constant dense<0.000000e+00> : vector<128x128xf32>
    %6 = tpu.matmul %5, %0, %cst_6 {dimension_numbers = #tpu.dot_dimension_numbers<[1], [0], [0], [1], [0, 0, 1, 1], [], []>} : vector<128x128xbf16>, vector<128x128xbf16>, vector<128x128xf32> -> vector<128x128xf32>
    %c2 = arith.constant 2 : index
    %c0_7 = arith.constant 0 : index
    %c0_8 = arith.constant 0 : index
    %7 = vector.load %arg1[%c2, %c0_7, %c0_8] : memref<4x128x128xbf16, #tpu.memory_space<vmem>>, vector<1x128x128xbf16>
    %8 = vector.shape_cast %7 : vector<1x128x128xbf16> to vector<128x128xbf16>
    %cst_9 = arith.constant dense<0.000000e+00> : vector<128x128xf32>
    %9 = tpu.matmul %8, %0, %cst_9 {dimension_numbers = #tpu.dot_dimension_numbers<[1], [0], [0], [1], [0, 0, 1, 1], [], []>} : vector<128x128xbf16>, vector<128x128xbf16>, vector<128x128xf32> -> vector<128x128xf32>
    %c3 = arith.constant 3 : index
    %c0_10 = arith.constant 0 : index
    %c0_11 = arith.constant 0 : index
    %10 = vector.load %arg1[%c3, %c0_10, %c0_11] : memref<4x128x128xbf16, #tpu.memory_space<vmem>>, vector<1x128x128xbf16>
    %11 = vector.shape_cast %10 : vector<1x128x128xbf16> to vector<128x128xbf16>
    %cst_12 = arith.constant dense<0.000000e+00> : vector<128x128xf32>
    %12 = tpu.matmul %11, %0, %cst_12 {dimension_numbers = #tpu.dot_dimension_numbers<[1], [0], [0], [1], [0, 0, 1, 1], [], []>} : vector<128x128xbf16>, vector<128x128xbf16>, vector<128x128xf32> -> vector<128x128xf32>
    %13 = arith.maximumf %3, %6 : vector<128x128xf32>
    %14 = arith.maximumf %9, %12 : vector<128x128xf32>
    %15 = arith.maximumf %13, %14 : vector<128x128xf32>
    %c0_13 = arith.constant 0 : index
    %c0_14 = arith.constant 0 : index
    %16 = vector.load %arg3[%c0_13, %c0_14] : memref<1x128xf32, #tpu.memory_space<vmem>>, vector<1x128xf32>
    %17 = vector.broadcast %16 : vector<1x128xf32> to vector<128x128xf32>
    %18 = arith.addf %15, %17 : vector<128x128xf32>
    %c0_15 = arith.constant 0 : index
    %c0_16 = arith.constant 0 : index
    %19 = vector.load %arg4[%c0_15, %c0_16] : memref<128x128xf32, #tpu.memory_space<vmem>>, vector<128x128xf32>
    tpu.vector_store %arg4[%c0_15, %c0_16], %18 {strides = array<i32>} : memref<128x128xf32, #tpu.memory_space<vmem>>, vector<128x128xf32>,
    return
  }
  func.func @transform_0(%arg0: i32) -> (i32, i32, i32) {
    %c0_i32 = arith.constant 0 : i32
    %c0_i32_0 = arith.constant 0 : i32
    %c0_i32_1 = arith.constant 0 : i32
    return %c0_i32, %arg0, %c0_i32_0 : i32, i32, i32
  }
  func.func @transform_1(%arg0: i32) -> (i32, i32) {
    %c0_i32 = arith.constant 0 : i32
    %c0_i32_0 = arith.constant 0 : i32
    %c0_i32_1 = arith.constant 0 : i32
    return %c0_i32, %c0_i32_0 : i32, i32
  }
  func.func @transform_2(%arg0: i32) -> (i32, i32) {
    %c0_i32 = arith.constant 0 : i32
    %c0_i32_0 = arith.constant 0 : i32
    %c0_i32_1 = arith.constant 0 : i32
    return %c0_i32, %c0_i32_0 : i32, i32
  }
  func.func @transform_3(%arg0: i32) -> (i32, i32) {
    %c0_i32 = arith.constant 0 : i32
    %c0_i32_0 = arith.constant 0 : i32
    return %arg0, %c0_i32 : i32, i32
  }
}

module attributes {stable_mosaic.version = 11 : i64} {
  func.func @_conv_pool_kernel(%arg0: i32, %arg1: memref<4x56x256xbf16, #tpu.memory_space<vmem>>, %arg2: memref<256x128xbf16, #tpu.memory_space<vmem>>, %arg3: memref<1x128xf32, #tpu.memory_space<vmem>>, %arg4: memref<56x128xf32, #tpu.memory_space<vmem>>) attributes {dimension_semantics = [#tpu.dimension_semantics<parallel>], iteration_bounds = array<i64: 1>, scalar_prefetch = 0 : i64, scratch_operands = 0 : i64, tpu.core_type = #tpu.core_type<tc>, window_params = [{transform_indices = @transform_0, window_bounds = array<i64: 4, 56, 256>}, {pipeline_mode = #tpu.pipeline_mode<synchronous>, transform_indices = @transform_1, window_bounds = array<i64: 256, 128>}, {pipeline_mode = #tpu.pipeline_mode<synchronous>, transform_indices = @transform_2, window_bounds = array<i64: 1, 128>}, {transform_indices = @transform_3, window_bounds = array<i64: 56, 128>}]} {
    %c0 = arith.constant 0 : index
    %c0_0 = arith.constant 0 : index
    %0 = vector.load %arg2[%c0, %c0_0] : memref<256x128xbf16, #tpu.memory_space<vmem>>, vector<256x128xbf16>
    %c0_1 = arith.constant 0 : index
    %c0_2 = arith.constant 0 : index
    %c0_3 = arith.constant 0 : index
    %1 = vector.load %arg1[%c0_1, %c0_2, %c0_3] : memref<4x56x256xbf16, #tpu.memory_space<vmem>>, vector<1x56x256xbf16>
    %2 = vector.shape_cast %1 : vector<1x56x256xbf16> to vector<56x256xbf16>
    %cst = arith.constant dense<0.000000e+00> : vector<56x128xf32>
    %3 = tpu.matmul %2, %0, %cst {dimension_numbers = #tpu.dot_dimension_numbers<[1], [0], [0], [1], [0, 0, 1, 1], [], []>} : vector<56x256xbf16>, vector<256x128xbf16>, vector<56x128xf32> -> vector<56x128xf32>
    %c1 = arith.constant 1 : index
    %c0_4 = arith.constant 0 : index
    %c0_5 = arith.constant 0 : index
    %4 = vector.load %arg1[%c1, %c0_4, %c0_5] : memref<4x56x256xbf16, #tpu.memory_space<vmem>>, vector<1x56x256xbf16>
    %5 = vector.shape_cast %4 : vector<1x56x256xbf16> to vector<56x256xbf16>
    %cst_6 = arith.constant dense<0.000000e+00> : vector<56x128xf32>
    %6 = tpu.matmul %5, %0, %cst_6 {dimension_numbers = #tpu.dot_dimension_numbers<[1], [0], [0], [1], [0, 0, 1, 1], [], []>} : vector<56x256xbf16>, vector<256x128xbf16>, vector<56x128xf32> -> vector<56x128xf32>
    %c2 = arith.constant 2 : index
    %c0_7 = arith.constant 0 : index
    %c0_8 = arith.constant 0 : index
    %7 = vector.load %arg1[%c2, %c0_7, %c0_8] : memref<4x56x256xbf16, #tpu.memory_space<vmem>>, vector<1x56x256xbf16>
    %8 = vector.shape_cast %7 : vector<1x56x256xbf16> to vector<56x256xbf16>
    %cst_9 = arith.constant dense<0.000000e+00> : vector<56x128xf32>
    %9 = tpu.matmul %8, %0, %cst_9 {dimension_numbers = #tpu.dot_dimension_numbers<[1], [0], [0], [1], [0, 0, 1, 1], [], []>} : vector<56x256xbf16>, vector<256x128xbf16>, vector<56x128xf32> -> vector<56x128xf32>
    %c3 = arith.constant 3 : index
    %c0_10 = arith.constant 0 : index
    %c0_11 = arith.constant 0 : index
    %10 = vector.load %arg1[%c3, %c0_10, %c0_11] : memref<4x56x256xbf16, #tpu.memory_space<vmem>>, vector<1x56x256xbf16>
    %11 = vector.shape_cast %10 : vector<1x56x256xbf16> to vector<56x256xbf16>
    %cst_12 = arith.constant dense<0.000000e+00> : vector<56x128xf32>
    %12 = tpu.matmul %11, %0, %cst_12 {dimension_numbers = #tpu.dot_dimension_numbers<[1], [0], [0], [1], [0, 0, 1, 1], [], []>} : vector<56x256xbf16>, vector<256x128xbf16>, vector<56x128xf32> -> vector<56x128xf32>
    %13 = arith.maximumf %3, %6 : vector<56x128xf32>
    %14 = arith.maximumf %9, %12 : vector<56x128xf32>
    %15 = arith.maximumf %13, %14 : vector<56x128xf32>
    %c0_13 = arith.constant 0 : index
    %c0_14 = arith.constant 0 : index
    %16 = vector.load %arg3[%c0_13, %c0_14] : memref<1x128xf32, #tpu.memory_space<vmem>>, vector<1x128xf32>
    %17 = vector.broadcast %16 : vector<1x128xf32> to vector<56x128xf32>
    %18 = arith.addf %15, %17 : vector<56x128xf32>
    %c0_15 = arith.constant 0 : index
    %c0_16 = arith.constant 0 : index
    %19 = vector.load %arg4[%c0_15, %c0_16] : memref<56x128xf32, #tpu.memory_space<vmem>>, vector<56x128xf32>
    tpu.vector_store %arg4[%c0_15, %c0_16], %18 {strides = array<i32>} : memref<56x128xf32, #tpu.memory_space<vmem>>, vector<56x128xf32>,
    return
  }
  func.func @transform_0(%arg0: i32) -> (i32, i32, i32) {
    %c0_i32 = arith.constant 0 : i32
    %c0_i32_0 = arith.constant 0 : i32
    %c0_i32_1 = arith.constant 0 : i32
    return %c0_i32, %arg0, %c0_i32_0 : i32, i32, i32
  }
  func.func @transform_1(%arg0: i32) -> (i32, i32) {
    %c0_i32 = arith.constant 0 : i32
    %c0_i32_0 = arith.constant 0 : i32
    %c0_i32_1 = arith.constant 0 : i32
    return %c0_i32, %c0_i32_0 : i32, i32
  }
  func.func @transform_2(%arg0: i32) -> (i32, i32) {
    %c0_i32 = arith.constant 0 : i32
    %c0_i32_0 = arith.constant 0 : i32
    %c0_i32_1 = arith.constant 0 : i32
    return %c0_i32, %c0_i32_0 : i32, i32
  }
  func.func @transform_3(%arg0: i32) -> (i32, i32) {
    %c0_i32 = arith.constant 0 : i32
    %c0_i32_0 = arith.constant 0 : i32
    return %arg0, %c0_i32 : i32, i32
  }
}

module attributes {stable_mosaic.version = 11 : i64} {
  func.func @_fc_kernel(%arg0: i32, %arg1: memref<8x3200xbf16, #tpu.memory_space<vmem>>, %arg2: memref<3200x128xbf16, #tpu.memory_space<vmem>>, %arg3: memref<1x128xf32, #tpu.memory_space<vmem>>, %arg4: memref<128x128xbf16, #tpu.memory_space<vmem>>, %arg5: memref<1x128xf32, #tpu.memory_space<vmem>>, %arg6: memref<128x128xbf16, #tpu.memory_space<vmem>>, %arg7: memref<1x128xf32, #tpu.memory_space<vmem>>, %arg8: memref<8x128xf32, #tpu.memory_space<vmem>>) attributes {dimension_semantics = [#tpu.dimension_semantics<parallel>], iteration_bounds = array<i64: 1>, scalar_prefetch = 0 : i64, scratch_operands = 0 : i64, tpu.core_type = #tpu.core_type<tc>, window_params = [{transform_indices = @transform_0, window_bounds = array<i64: 8, 3200>}, {pipeline_mode = #tpu.pipeline_mode<synchronous>, transform_indices = @transform_1, window_bounds = array<i64: 3200, 128>}, {pipeline_mode = #tpu.pipeline_mode<synchronous>, transform_indices = @transform_2, window_bounds = array<i64: 1, 128>}, {pipeline_mode = #tpu.pipeline_mode<synchronous>, transform_indices = @transform_3, window_bounds = array<i64: 128, 128>}, {pipeline_mode = #tpu.pipeline_mode<synchronous>, transform_indices = @transform_4, window_bounds = array<i64: 1, 128>}, {pipeline_mode = #tpu.pipeline_mode<synchronous>, transform_indices = @transform_5, window_bounds = array<i64: 128, 128>}, {pipeline_mode = #tpu.pipeline_mode<synchronous>, transform_indices = @transform_6, window_bounds = array<i64: 1, 128>}, {transform_indices = @transform_7, window_bounds = array<i64: 8, 128>}]} {
    %c0 = arith.constant 0 : index
    %c0_0 = arith.constant 0 : index
    %0 = vector.load %arg1[%c0, %c0_0] : memref<8x3200xbf16, #tpu.memory_space<vmem>>, vector<8x3200xbf16>
    %c0_1 = arith.constant 0 : index
    %c0_2 = arith.constant 0 : index
    %1 = vector.load %arg2[%c0_1, %c0_2] : memref<3200x128xbf16, #tpu.memory_space<vmem>>, vector<3200x128xbf16>
    %cst = arith.constant dense<0.000000e+00> : vector<8x128xf32>
    %2 = tpu.matmul %0, %1, %cst {dimension_numbers = #tpu.dot_dimension_numbers<[1], [0], [0], [1], [0, 0, 1, 1], [], []>} : vector<8x3200xbf16>, vector<3200x128xbf16>, vector<8x128xf32> -> vector<8x128xf32>
    %c0_3 = arith.constant 0 : index
    %c0_4 = arith.constant 0 : index
    %3 = vector.load %arg3[%c0_3, %c0_4] : memref<1x128xf32, #tpu.memory_space<vmem>>, vector<1x128xf32>
    %4 = vector.broadcast %3 : vector<1x128xf32> to vector<8x128xf32>
    %5 = arith.addf %2, %4 : vector<8x128xf32>
    %6 = arith.truncf %5 : vector<8x128xf32> to vector<8x128xbf16>
    %c0_5 = arith.constant 0 : index
    %c0_6 = arith.constant 0 : index
    %7 = vector.load %arg4[%c0_5, %c0_6] : memref<128x128xbf16, #tpu.memory_space<vmem>>, vector<128x128xbf16>
    %cst_7 = arith.constant dense<0.000000e+00> : vector<8x128xf32>
    %8 = tpu.matmul %6, %7, %cst_7 {dimension_numbers = #tpu.dot_dimension_numbers<[1], [0], [0], [1], [0, 0, 1, 1], [], []>} : vector<8x128xbf16>, vector<128x128xbf16>, vector<8x128xf32> -> vector<8x128xf32>
    %c0_8 = arith.constant 0 : index
    %c0_9 = arith.constant 0 : index
    %9 = vector.load %arg5[%c0_8, %c0_9] : memref<1x128xf32, #tpu.memory_space<vmem>>, vector<1x128xf32>
    %10 = vector.broadcast %9 : vector<1x128xf32> to vector<8x128xf32>
    %11 = arith.addf %8, %10 : vector<8x128xf32>
    %12 = arith.truncf %11 : vector<8x128xf32> to vector<8x128xbf16>
    %c0_10 = arith.constant 0 : index
    %c0_11 = arith.constant 0 : index
    %13 = vector.load %arg6[%c0_10, %c0_11] : memref<128x128xbf16, #tpu.memory_space<vmem>>, vector<128x128xbf16>
    %cst_12 = arith.constant dense<0.000000e+00> : vector<8x128xf32>
    %14 = tpu.matmul %12, %13, %cst_12 {dimension_numbers = #tpu.dot_dimension_numbers<[1], [0], [0], [1], [0, 0, 1, 1], [], []>} : vector<8x128xbf16>, vector<128x128xbf16>, vector<8x128xf32> -> vector<8x128xf32>
    %c0_13 = arith.constant 0 : index
    %c0_14 = arith.constant 0 : index
    %15 = vector.load %arg7[%c0_13, %c0_14] : memref<1x128xf32, #tpu.memory_space<vmem>>, vector<1x128xf32>
    %16 = vector.broadcast %15 : vector<1x128xf32> to vector<8x128xf32>
    %17 = arith.addf %14, %16 : vector<8x128xf32>
    %c0_15 = arith.constant 0 : index
    %c0_16 = arith.constant 0 : index
    %18 = vector.load %arg8[%c0_15, %c0_16] : memref<8x128xf32, #tpu.memory_space<vmem>>, vector<8x128xf32>
    tpu.vector_store %arg8[%c0_15, %c0_16], %17 {strides = array<i32>} : memref<8x128xf32, #tpu.memory_space<vmem>>, vector<8x128xf32>,
    return
  }
  func.func @transform_0(%arg0: i32) -> (i32, i32) {
    %c0_i32 = arith.constant 0 : i32
    %c0_i32_0 = arith.constant 0 : i32
    return %arg0, %c0_i32 : i32, i32
  }
  func.func @transform_1(%arg0: i32) -> (i32, i32) {
    %c0_i32 = arith.constant 0 : i32
    %c0_i32_0 = arith.constant 0 : i32
    %c0_i32_1 = arith.constant 0 : i32
    return %c0_i32, %c0_i32_0 : i32, i32
  }
  func.func @transform_2(%arg0: i32) -> (i32, i32) {
    %c0_i32 = arith.constant 0 : i32
    %c0_i32_0 = arith.constant 0 : i32
    %c0_i32_1 = arith.constant 0 : i32
    return %c0_i32, %c0_i32_0 : i32, i32
  }
  func.func @transform_3(%arg0: i32) -> (i32, i32) {
    %c0_i32 = arith.constant 0 : i32
    %c0_i32_0 = arith.constant 0 : i32
    %c0_i32_1 = arith.constant 0 : i32
    return %c0_i32, %c0_i32_0 : i32, i32
  }
  func.func @transform_4(%arg0: i32) -> (i32, i32) {
    %c0_i32 = arith.constant 0 : i32
    %c0_i32_0 = arith.constant 0 : i32
    %c0_i32_1 = arith.constant 0 : i32
    return %c0_i32, %c0_i32_0 : i32, i32
  }
  func.func @transform_5(%arg0: i32) -> (i32, i32) {
    %c0_i32 = arith.constant 0 : i32
    %c0_i32_0 = arith.constant 0 : i32
    %c0_i32_1 = arith.constant 0 : i32
    return %c0_i32, %c0_i32_0 : i32, i32
  }
  func.func @transform_6(%arg0: i32) -> (i32, i32) {
    %c0_i32 = arith.constant 0 : i32
    %c0_i32_0 = arith.constant 0 : i32
    %c0_i32_1 = arith.constant 0 : i32
    return %c0_i32, %c0_i32_0 : i32, i32
  }
  func.func @transform_7(%arg0: i32) -> (i32, i32) {
    %c0_i32 = arith.constant 0 : i32
    %c0_i32_0 = arith.constant 0 : i32
    return %arg0, %c0_i32 : i32, i32
  }
}

</mosaic_0001>

<bundles_post_ra>
// kernel: lenet_forward.3
= control target key start
LH: loop header
LB: loop body
LE: loop exit
PB: predicated region body
PF: predicated region fallthrough
CT: control target
= control target key end

     0   :  { %s1733_s12 = smov 0   ;;  %s1735_s13 = smov 0   ;;  %s2072_s0 = inlined_call_operand.vmem [shape: bf16[4,512,128], index: 0, kind: input, shape index: {}]   ;;  %s2073_s1 = inlined_call_operand.vmem [shape: bf16[128,128], index: 1, kind: input, shape index: {}]   ;;  %s2074_s2 = inlined_call_operand.vmem [shape: f32[1,128], index: 2, kind: input, shape index: {}]   ;;  %s2075_s3 = inlined_call_operand.vmem [shape: f32[512,128], index: 3, kind: output, shape index: {}]  }
   0x1   :  { %s1737_s14 = smov 0  }
   0x2 LB: > { %s1330_s15 = sadd.s32 4294967295, %s1711_s14   ;;  %s1750_s16 = sadd.s32 1, %s1711_s14   ;;  %s1711_s14 = sphi %s1737_s14, %s2078_s14   ;;  %s1707_s13 = sphi %s1735_s13, %s2077_s13   ;;  %s1703_s12 = sphi %s1733_s12, %s2076_s12  }
   0x3   : > { %s17_s17 = ssub.s32 %s1711_s14, %s1750_s16  ;;  %s20_s18 = sadd.s32 1, %s1707_s13 }
   0x4   : > { %p18_p0 = scmp.eq.s32.totalorder %s17_s17, 0  ;;  %p27_p1 = scmp.ne.s32.totalorder %s1707_s13, %s1703_s12 }
   0x5   : > { %p28_p2 = scmp.eq.s32.totalorder %s1711_s14, 0  ;;  %p1333_p4 = scmp.ge.s32.totalorder %s1711_s14, 4 }
   0x6   : > { %s1759_s19 = scalar_select %p18_p0, %s1707_s13, %s20_s18  }
   0x7   : > { %p29_p3 = por %p28_p2, %p27_p1  ;;  %127 = sbr.rel (%p1333_p4) target bundleno = 32 (0x20), region = 24 }
   0xc   : > { %130 = sbr.rel (!%p29_p3) target bundleno = 32 (0x20), region = 28  ;;  %s132_s20 = sand.u32 (%p29_p3), 1, %s1707_s13  }
   0xd   : > { %s1432_s21 = sshll.u32 (%p29_p3), %s1711_s14, 6  ;;  %s1334_s22 = sshll.u32 (%p29_p3), %s132_s20, 8 }
   0xe   : > { %s1767_s25 = scalar_lea.vmem (%p29_p3), %s2072_s0, %s1432_s21  ;;  %s1772_s26 = scalar_lea.vmem (%p29_p3), [#allocation2], %s1334_s22 }
   0xf   : > { %v154_v0 = vld [vmem:[%s1767_s25] sm:$0xff] (%p29_p3)   ;;  %v158_v1 = vld [vmem:[%s1767_s25 + $0x8] sm:$0xff] (%p29_p3)   ;;  %v162_v2 = vld [vmem:[%s1767_s25 + $0x10] sm:$0xff] (%p29_p3)  }
  0x10   : > { %155 = vst [vmem:[%s1772_s26] sm:$0xff] (%p29_p3), %v154_v0   ;;  %159 = vst [vmem:[%s1772_s26 + $0x8] sm:$0xff] (%p29_p3), %v158_v1   ;;  %v166_v3 = vld [vmem:[%s1767_s25 + $0x18] sm:$0xff] (%p29_p3)   ;;  %v170_v4 = vld [vmem:[%s1767_s25 + $0x20] sm:$0xff] (%p29_p3)  }
  0x11   : > { %163 = vst [vmem:[%s1772_s26 + $0x10] sm:$0xff] %v162_v2   ;;  %v174_v5 = vld [vmem:[%s1767_s25 + $0x28] sm:$0xff]   ;;  %167 = vst [vmem:[%s1772_s26 + $0x18] sm:$0xff] %v166_v3   ;;  %v178_v6 = vld [vmem:[%s1767_s25 + $0x30] sm:$0xff]  }
  0x12   : > { %171 = vst [vmem:[%s1772_s26 + $0x20] sm:$0xff] %v170_v4   ;;  %175 = vst [vmem:[%s1772_s26 + $0x28] sm:$0xff] %v174_v5   ;;  %v182_v7 = vld [vmem:[%s1767_s25 + $0x38] sm:$0xff]   ;;  %v186_v8 = vld [vmem:[%s1767_s25 + $0x100] sm:$0xff]  }
  0x13   : > { %179 = vst [vmem:[%s1772_s26 + $0x30] sm:$0xff] %v178_v6   ;;  %183 = vst [vmem:[%s1772_s26 + $0x38] sm:$0xff] %v182_v7   ;;  %v190_v9 = vld [vmem:[%s1767_s25 + $0x108] sm:$0xff]   ;;  %v194_v10 = vld [vmem:[%s1767_s25 + $0x110] sm:$0xff]  }
  0x14   : > { %187 = vst [vmem:[%s1772_s26 + $0x40] sm:$0xff] %v186_v8   ;;  %v198_v11 = vld [vmem:[%s1767_s25 + $0x118] sm:$0xff]   ;;  %191 = vst [vmem:[%s1772_s26 + $0x48] sm:$0xff] %v190_v9   ;;  %v202_v12 = vld [vmem:[%s1767_s25 + $0x120] sm:$0xff]  }
  0x15   : > { %195 = vst [vmem:[%s1772_s26 + $0x50] sm:$0xff] %v194_v10   ;;  %199 = vst [vmem:[%s1772_s26 + $0x58] sm:$0xff] %v198_v11   ;;  %v206_v13 = vld [vmem:[%s1767_s25 + $0x128] sm:$0xff]   ;;  %v210_v14 = vld [vmem:[%s1767_s25 + $0x130] sm:$0xff]  }
  0x16   : > { %203 = vst [vmem:[%s1772_s26 + $0x60] sm:$0xff] %v202_v12   ;;  %207 = vst [vmem:[%s1772_s26 + $0x68] sm:$0xff] %v206_v13   ;;  %v214_v15 = vld [vmem:[%s1767_s25 + $0x138] sm:$0xff]   ;;  %v218_v16 = vld [vmem:[%s1767_s25 + $0x200] sm:$0xff]  }
  0x17   : > { %211 = vst [vmem:[%s1772_s26 + $0x70] sm:$0xff] %v210_v14   ;;  %v222_v17 = vld [vmem:[%s1767_s25 + $0x208] sm:$0xff]   ;;  %215 = vst [vmem:[%s1772_s26 + $0x78] sm:$0xff] %v214_v15   ;;  %v226_v18 = vld [vmem:[%s1767_s25 + $0x210] sm:$0xff]  }
  0x18   : > { %219 = vst [vmem:[%s1772_s26 + $0x80] sm:$0xff] %v218_v16   ;;  %223 = vst [vmem:[%s1772_s26 + $0x88] sm:$0xff] %v222_v17   ;;  %v230_v19 = vld [vmem:[%s1767_s25 + $0x218] sm:$0xff]   ;;  %v234_v20 = vld [vmem:[%s1767_s25 + $0x220] sm:$0xff]  }
  0x19   : > { %227 = vst [vmem:[%s1772_s26 + $0x90] sm:$0xff] %v226_v18   ;;  %231 = vst [vmem:[%s1772_s26 + $0x98] sm:$0xff] %v230_v19   ;;  %v238_v21 = vld [vmem:[%s1767_s25 + $0x228] sm:$0xff]   ;;  %v242_v22 = vld [vmem:[%s1767_s25 + $0x230] sm:$0xff]  }
  0x1a   : > { %235 = vst [vmem:[%s1772_s26 + $0xa0] sm:$0xff] %v234_v20   ;;  %v246_v23 = vld [vmem:[%s1767_s25 + $0x238] sm:$0xff]   ;;  %239 = vst [vmem:[%s1772_s26 + $0xa8] sm:$0xff] %v238_v21   ;;  %v250_v24 = vld [vmem:[%s1767_s25 + $0x300] sm:$0xff]  }
  0x1b   : > { %243 = vst [vmem:[%s1772_s26 + $0xb0] sm:$0xff] %v242_v22   ;;  %247 = vst [vmem:[%s1772_s26 + $0xb8] sm:$0xff] %v246_v23   ;;  %v254_v25 = vld [vmem:[%s1767_s25 + $0x308] sm:$0xff]   ;;  %v258_v26 = vld [vmem:[%s1767_s25 + $0x310] sm:$0xff]  }
  0x1c   : > { %251 = vst [vmem:[%s1772_s26 + $0xc0] sm:$0xff] %v250_v24   ;;  %255 = vst [vmem:[%s1772_s26 + $0xc8] sm:$0xff] %v254_v25   ;;  %v262_v27 = vld [vmem:[%s1767_s25 + $0x318] sm:$0xff]   ;;  %v266_v28 = vld [vmem:[%s1767_s25 + $0x320] sm:$0xff]  }
  0x1d   : > { %259 = vst [vmem:[%s1772_s26 + $0xd0] sm:$0xff] %v258_v26   ;;  %v270_v29 = vld [vmem:[%s1767_s25 + $0x328] sm:$0xff]   ;;  %263 = vst [vmem:[%s1772_s26 + $0xd8] sm:$0xff] %v262_v27   ;;  %v274_v30 = vld [vmem:[%s1767_s25 + $0x330] sm:$0xff]  }
  0x1e   : > { %267 = vst [vmem:[%s1772_s26 + $0xe0] sm:$0xff] %v266_v28   ;;  %271 = vst [vmem:[%s1772_s26 + $0xe8] sm:$0xff] %v270_v29   ;;  %v278_v31 = vld [vmem:[%s1767_s25 + $0x338] sm:$0xff]  }
  0x1f   : > { %275 = vst [vmem:[%s1772_s26 + $0xf0] sm:$0xff] %v274_v30   ;;  %279 = vst [vmem:[%s1772_s26 + $0xf8] sm:$0xff] %v278_v31  }
  0x20 PF: > { %p1337_p5 = scmp.ge.s32.totalorder %s1711_s14, 1  ;;  %p432_p6 = scmp.lt.s32.totalorder %s1711_s14, 5 }
  0x22   : > { %p433_p7 = pnand %p1337_p5, %p432_p6 }
  0x23   : > { %s439_s29 = sand.u32 (!%p433_p7), 1, %s1703_s12   ;;  %s1339_s24 = sshll.u32 (!%p433_p7), %s1330_s15, 4 }
  0x24   : > { %436 = sbr.rel (%p433_p7) target bundleno = 336 (0x150), region = 69  ;;  %s1338_s5 = sshll.u32 (!%p433_p7), %s439_s29, 8 }
  0x25   : > { %s1852_s10 = scalar_lea.vmem (!%p433_p7), [#allocation2], %s1338_s5  ;;  %p464_p8 = scmp.lt.s32.totalorder (!%p433_p7), %s1339_s24, 63 }
  0x29   : > { %v1649_v32 = vld [vmem:[%s2073_s1 + $0x38] sm:$0xff]   ;;  %v1650_v33 = vld [vmem:[%s2073_s1 + $0x30] sm:$0xff]   ;;  %v1651_v34 = vld [vmem:[%s2073_s1 + $0x28] sm:$0xff]   ;;  %s2080_s24 = smov (!%p464_p8, %s1339_s24), 63 }
  0x2a   : > { %1497 = vmatprep.subr.bf16.mxu0 %v1649_v32  ;;  %1529 = vmatprep.subr.bf16.mxu1 %v1649_v32  ;;  %v1850_v35 = vld [vmem:[%s2073_s1 + $0x20] sm:$0xff]   ;;  %v1861_v38 = vld [vmem:[%s2073_s1 + $0x18] sm:$0xff]   ;;  %v1870_v39 = vld [vmem:[%s2073_s1 + $0x10] sm:$0xff]   ;;  %s1340_s14 = sshll.u32 %s2080_s24, 3 }
  0x2b   : > { %1498 = vmatpush3.bf16.msra.mxu0 %v1649_v32  ;;  %1530 = vmatpush3.bf16.msra.mxu1 %v1649_v32  ;;  %v1657_v36 = vld [vmem:[%s1852_s10] sm:$0xff]   ;;  %v1879_v40 = vld [vmem:[%s2073_s1 + $0x8] sm:$0xff]   ;;  %v1661_v44 = vld [vmem:[%s1852_s10 + $0x10] sm:$0xff]   ;;  %s2004_s28 = scalar_lea.vmem %s2075_s3, %s1340_s14 }
  0x2c   : > { %1499 = vmatprep.subr.bf16.mxu0 %v1650_v33  ;;  %1531 = vmatprep.subr.bf16.mxu1 %v1650_v33  ;;  %v1658_v37 = vld [vmem:[%s1852_s10 + $0x40] sm:$0xff]   ;;  %v1659_v42 = vld [vmem:[%s1852_s10 + $0x8] sm:$0xff]   ;;  %v1662_v45 = vld [vmem:[%s1852_s10 + $0x50] sm:$0xff]  }
  0x2d   : > { %1513 = vmatprep.mubr.bf16.mxu0 %v1657_v36  ;;  %1545 = vmatprep.mubr.bf16.mxu1 %v1658_v37  ;;  %v1888_v41 = vld [vmem:[%s2073_s1] sm:$0xff]   ;;  %v1660_v43 = vld [vmem:[%s1852_s10 + $0x48] sm:$0xff]   ;;  %v1663_v46 = vld [vmem:[%s1852_s10 + $0x18] sm:$0xff]  }
  0x2e   : > { %v1664_v47 = vld [vmem:[%s1852_s10 + $0x58] sm:$0xff]   ;;  %v1665_v48 = vld [vmem:[%s1852_s10 + $0x20] sm:$0xff]   ;;  %v1667_v50 = vld [vmem:[%s1852_s10 + $0x28] sm:$0xff]  }
  0x2f   : > { %1500 = vmatpush3.bf16.msra.mxu0 %v1650_v33  ;;  %1532 = vmatpush3.bf16.msra.mxu1 %v1650_v33  ;;  %v1666_v49 = vld [vmem:[%s1852_s10 + $0x60] sm:$0xff]   ;;  %v1668_v51 = vld [vmem:[%s1852_s10 + $0x68] sm:$0xff]   ;;  %v1669_v52 = vld [vmem:[%s1852_s10 + $0x30] sm:$0xff]  }
  0x30   : > { %1501 = vmatprep.subr.bf16.mxu0 %v1651_v34  ;;  %1533 = vmatprep.subr.bf16.mxu1 %v1651_v34  ;;  %v1670_v53 = vld [vmem:[%s1852_s10 + $0x70] sm:$0xff]   ;;  %v1671_v54 = vld [vmem:[%s1852_s10 + $0x38] sm:$0xff]   ;;  %v1673_v56 = vld [vmem:[%s1852_s10 + $0x80] sm:$0xff]  }
  0x31   : > { %v1672_v55 = vld [vmem:[%s1852_s10 + $0x78] sm:$0xff]   ;;  %v1674_v57 = vld [vmem:[%s1852_s10 + $0xc0] sm:$0xff]   ;;  %v1675_v58 = vld [vmem:[%s1852_s10 + $0x88] sm:$0xff]  }
  0x32   : > { %v1676_v59 = vld [vmem:[%s1852_s10 + $0xc8] sm:$0xff]   ;;  %v1677_v60 = vld [vmem:[%s1852_s10 + $0x90] sm:$0xff]   ;;  %v1679_v62 = vld [vmem:[%s1852_s10 + $0x98] sm:$0xff]  }
  0x33   : > { %1502 = vmatpush3.bf16.msra.mxu0 %v1651_v34  ;;  %1534 = vmatpush3.bf16.msra.mxu1 %v1651_v34  ;;  %v1678_v61 = vld [vmem:[%s1852_s10 + $0xd0] sm:$0xff]   ;;  %v1680_v63 = vld [vmem:[%s1852_s10 + $0xd8] sm:$0xff]   ;;  %v1681_v0 = vld [vmem:[%s1852_s10 + $0xa0] sm:$0xff]  }
  0x34   : > { %1503 = vmatprep.subr.bf16.mxu0 %v1850_v35  ;;  %1535 = vmatprep.subr.bf16.mxu1 %v1850_v35  ;;  %v1682_v1 = vld [vmem:[%s1852_s10 + $0xe0] sm:$0xff]   ;;  %v1683_v2 = vld [vmem:[%s1852_s10 + $0xa8] sm:$0xff]   ;;  %v1685_v4 = vld [vmem:[%s1852_s10 + $0xb0] sm:$0xff]  }
  0x35   : > { %v1684_v3 = vld [vmem:[%s1852_s10 + $0xe8] sm:$0xff]   ;;  %v1686_v5 = vld [vmem:[%s1852_s10 + $0xf0] sm:$0xff]   ;;  %v1687_v6 = vld [vmem:[%s1852_s10 + $0xb8] sm:$0xff]  }
  0x36   : > { %v1688_v7 = vld [vmem:[%s1852_s10 + $0xf8] sm:$0xff]  }
  0x37   : > { %1504 = vmatpush3.bf16.msra.mxu0 %v1850_v35  ;;  %1536 = vmatpush3.bf16.msra.mxu1 %v1850_v35 }
  0x38   : > { %1505 = vmatprep.subr.bf16.mxu0 %v1861_v38  ;;  %1537 = vmatprep.subr.bf16.mxu1 %v1861_v38 }
  0x3b   : > { %1506 = vmatpush3.bf16.msra.mxu0 %v1861_v38  ;;  %1538 = vmatpush3.bf16.msra.mxu1 %v1861_v38 }
  0x3c   : > { %1507 = vmatprep.subr.bf16.mxu0 %v1870_v39  ;;  %1539 = vmatprep.subr.bf16.mxu1 %v1870_v39 }
  0x3f   : > { %1508 = vmatpush3.bf16.msra.mxu0 %v1870_v39  ;;  %1540 = vmatpush3.bf16.msra.mxu1 %v1870_v39 }
  0x40   : > { %1509 = vmatprep.subr.bf16.mxu0 %v1879_v40  ;;  %1541 = vmatprep.subr.bf16.mxu1 %v1879_v40 }
  0x43   : > { %1510 = vmatpush3.bf16.msra.mxu0 %v1879_v40  ;;  %1542 = vmatpush3.bf16.msra.mxu1 %v1879_v40 }
  0x44   : > { %1511 = vmatprep.subr.bf16.mxu0 %v1888_v41  ;;  %1543 = vmatprep.subr.bf16.mxu1 %v1888_v41 }
  0x47   : > { %1512 = vmatpush3.bf16.msra.mxu0 %v1888_v41  ;;  %1544 = vmatpush3.bf16.msra.mxu1 %v1888_v41 }
  0x48   : > { %1561 = vmatprep.subr.bf16.mxu0 %v1649_v32  ;;  %1593 = vmatprep.subr.bf16.mxu1 %v1649_v32 }
  0x4a   : > { %1514 = vmatmul.mubr.bf16.vlgmr.msra.gmra.mxu0 %v1659_v42  ;;  %1546 = vmatmul.mubr.bf16.vlgmr.msra.gmra.mxu1 %v1660_v43 }
  0x4b   : > { %1562 = vmatpush3.bf16.msra.mxu0 %v1649_v32  ;;  %1594 = vmatpush3.bf16.msra.mxu1 %v1649_v32 }
  0x4c   : > { %1563 = vmatprep.subr.bf16.mxu0 %v1650_v33  ;;  %1595 = vmatprep.subr.bf16.mxu1 %v1650_v33 }
  0x4d   : > { %1517 = vmatprep.mubr.bf16.mxu0 %v1661_v44  ;;  %1549 = vmatprep.mubr.bf16.mxu1 %v1662_v45  ;;  %v1999_v44 = vld [vmem:[%s2074_s2] ss:$0 sm:$0xff] }
  0x4f   : > { %1564 = vmatpush3.bf16.msra.mxu0 %v1650_v33  ;;  %1596 = vmatpush3.bf16.msra.mxu1 %v1650_v33 }
  0x50   : > { %1565 = vmatprep.subr.bf16.mxu0 %v1651_v34  ;;  %1597 = vmatprep.subr.bf16.mxu1 %v1651_v34 }
  0x52   : > { %1518 = vmatmul.mubr.bf16.gmra.mxu0 %v1663_v46  ;;  %1550 = vmatmul.mubr.bf16.gmra.mxu1 %v1664_v47 }
  0x53   : > { %1566 = vmatpush3.bf16.msra.mxu0 %v1651_v34  ;;  %1598 = vmatpush3.bf16.msra.mxu1 %v1651_v34 }
  0x54   : > { %1567 = vmatprep.subr.bf16.mxu0 %v1850_v35  ;;  %1599 = vmatprep.subr.bf16.mxu1 %v1850_v35 }
  0x55   : > { %1521 = vmatprep.mubr.bf16.mxu0 %v1665_v48  ;;  %1553 = vmatprep.mubr.bf16.mxu1 %v1666_v49 }
  0x57   : > { %1568 = vmatpush3.bf16.msra.mxu0 %v1850_v35  ;;  %1600 = vmatpush3.bf16.msra.mxu1 %v1850_v35 }
  0x58   : > { %1569 = vmatprep.subr.bf16.mxu0 %v1861_v38  ;;  %1601 = vmatprep.subr.bf16.mxu1 %v1861_v38 }
  0x5a   : > { %1522 = vmatmul.mubr.bf16.gmra.mxu0 %v1667_v50  ;;  %1554 = vmatmul.mubr.bf16.gmra.mxu1 %v1668_v51 }
  0x5b   : > { %1570 = vmatpush3.bf16.msra.mxu0 %v1861_v38  ;;  %1602 = vmatpush3.bf16.msra.mxu1 %v1861_v38 }
  0x5c   : > { %1571 = vmatprep.subr.bf16.mxu0 %v1870_v39  ;;  %1603 = vmatprep.subr.bf16.mxu1 %v1870_v39 }
  0x5d   : > { %1525 = vmatprep.mubr.bf16.mxu0 %v1669_v52  ;;  %1557 = vmatprep.mubr.bf16.mxu1 %v1670_v53 }
  0x5f   : > { %1572 = vmatpush3.bf16.msra.mxu0 %v1870_v39  ;;  %1604 = vmatpush3.bf16.msra.mxu1 %v1870_v39 }
  0x60   : > { %1573 = vmatprep.subr.bf16.mxu0 %v1879_v40  ;;  %1605 = vmatprep.subr.bf16.mxu1 %v1879_v40 }
  0x62   : > { %1526 = vmatmul.mubr.bf16.gmra.mxu0 %v1671_v54  ;;  %1558 = vmatmul.mubr.bf16.gmra.mxu1 %v1672_v55 }
  0x63   : > { %1574 = vmatpush3.bf16.msra.mxu0 %v1879_v40  ;;  %1606 = vmatpush3.bf16.msra.mxu1 %v1879_v40 }
  0x64   : > { %1575 = vmatprep.subr.bf16.mxu0 %v1888_v41  ;;  %1607 = vmatprep.subr.bf16.mxu1 %v1888_v41 }
  0x65   : > { %1577 = vmatprep.mubr.bf16.mxu0 %v1673_v56  ;;  %1609 = vmatprep.mubr.bf16.mxu1 %v1674_v57 }
  0x67   : > { %1576 = vmatpush3.bf16.msra.mxu0 %v1888_v41  ;;  %1608 = vmatpush3.bf16.msra.mxu1 %v1888_v41 }
  0x6a   : > { %1578 = vmatmul.mubr.bf16.vlgmr.msra.gmra.mxu0 %v1675_v58  ;;  %1610 = vmatmul.mubr.bf16.vlgmr.msra.gmra.mxu1 %v1676_v59 }
  0x6b   : > { %1581 = vmatprep.mubr.bf16.mxu0 %v1677_v60  ;;  %1613 = vmatprep.mubr.bf16.mxu1 %v1678_v61 }
  0x72   : > { %1582 = vmatmul.mubr.bf16.gmra.mxu0 %v1679_v62  ;;  %1614 = vmatmul.mubr.bf16.gmra.mxu1 %v1680_v63 }
  0x73   : > { %1585 = vmatprep.mubr.bf16.mxu0 %v1681_v0  ;;  %1617 = vmatprep.mubr.bf16.mxu1 %v1682_v1 }
  0x7a   : > { %1586 = vmatmul.mubr.bf16.gmra.mxu0 %v1683_v2  ;;  %1618 = vmatmul.mubr.bf16.gmra.mxu1 %v1684_v3 }
  0x7b   : > { %1589 = vmatprep.mubr.bf16.mxu0 %v1685_v4  ;;  %1621 = vmatprep.mubr.bf16.mxu1 %v1686_v5 }
  0x82   : > { %1590 = vmatmul.mubr.bf16.gmra.mxu0 %v1687_v6  ;;  %1622 = vmatmul.mubr.bf16.gmra.mxu1 %v1688_v7 }
 0x10a   : > { %v1515_v8 = vpop.f32.mrf.mxu0  ;;  %v1547_v9 = vpop.f32.mrf.mxu1 }
 0x10b   : > { %v1183_v42 = vmax.f32 %v1515_v8, %v1547_v9 }
 0x10c   : > { %v632_v10 = vpop.f32.mrf.mxu0  ;;  %v794_v11 = vpop.f32.mrf.mxu1 }
 0x10d   : > { %v1181_v47 = vmax.f32 %v632_v10, %v794_v11 }
 0x10e   : > { %v1516_v12 = vpop.f32.mrf.mxu0  ;;  %v1548_v13 = vpop.f32.mrf.mxu1 }
 0x10f   : > { %v1184_v52 = vmax.f32 %v1516_v12, %v1548_v13 }
 0x110   : > { %v635_v14 = vpop.f32.mrf.mxu0  ;;  %v797_v15 = vpop.f32.mrf.mxu1 }
 0x111   : > { %v1182_v58 = vmax.f32 %v635_v14, %v797_v15 }
 0x112   : > { %v1946_v16 = vpop.f32.mrf.mxu0  ;;  %v1948_v17 = vpop.f32.mrf.mxu1 }
 0x113   : > { %v1187_v0 = vmax.f32 %v1946_v16, %v1948_v17 }
 0x114   : > { %v1950_v18 = vpop.f32.mrf.mxu0  ;;  %v1952_v19 = vpop.f32.mrf.mxu1 }
 0x115   : > { %v1185_v6 = vmax.f32 %v1950_v18, %v1952_v19 }
 0x116   : > { %v1954_v20 = vpop.f32.mrf.mxu0  ;;  %v1956_v21 = vpop.f32.mrf.mxu1 }
 0x117   : > { %v1188_v12 = vmax.f32 %v1954_v20, %v1956_v21 }
 0x118   : > { %v1958_v22 = vpop.f32.mrf.mxu0  ;;  %v1960_v23 = vpop.f32.mrf.mxu1 }
 0x119   : > { %v1186_v18 = vmax.f32 %v1958_v22, %v1960_v23 }
 0x11a   : > { %v1962_v24 = vpop.f32.mrf.mxu0  ;;  %v1964_v25 = vpop.f32.mrf.mxu1 }
 0x11b   : > { %v1191_v20 = vmax.f32 %v1962_v24, %v1964_v25 }
 0x11c   : > { %v1966_v26 = vpop.f32.mrf.mxu0  ;;  %v1968_v27 = vpop.f32.mrf.mxu1 }
 0x11d   : > { %v1189_v22 = vmax.f32 %v1966_v26, %v1968_v27 }
 0x11e   : > { %v1970_v28 = vpop.f32.mrf.mxu0  ;;  %v1972_v29 = vpop.f32.mrf.mxu1 }
 0x11f   : > { %v1192_v24 = vmax.f32 %v1970_v28, %v1972_v29 }
 0x120   : > { %v1974_v30 = vpop.f32.mrf.mxu0  ;;  %v1976_v31 = vpop.f32.mrf.mxu1 }
 0x121   : > { %v1190_v26 = vmax.f32 %v1974_v30, %v1976_v31 }
 0x122   : > { %v1980_v32 = vpop.f32.mrf.mxu0  ;;  %v1982_v33 = vpop.f32.mrf.mxu1 }
 0x123   : > { %v1195_v28 = vmax.f32 %v1980_v32, %v1982_v33 }
 0x124   : > { %v1984_v34 = vpop.f32.mrf.mxu0  ;;  %v1986_v35 = vpop.f32.mrf.mxu1 }
 0x125   : > { %v1193_v30 = vmax.f32 %v1984_v34, %v1986_v35 }
 0x126   : > { %v1988_v36 = vpop.f32.mrf.mxu0  ;;  %v1990_v37 = vpop.f32.mrf.mxu1 }
 0x127   : > { %v1196_v32 = vmax.f32 %v1988_v36, %v1990_v37 }
 0x128   : > { %v1992_v38 = vpop.f32.mrf.mxu0  ;;  %v1994_v39 = vpop.f32.mrf.mxu1 }
 0x129   : > { %v1194_v35 = vmax.f32 %v1992_v38, %v1994_v39 }
 0x12a   : > { %v1579_v40 = vpop.f32.mrf.mxu0  ;;  %v1611_v41 = vpop.f32.mrf.mxu1 }
 0x12b   : > { %v1199_v43 = vmax.f32 %v1579_v40, %v1611_v41 }
 0x12c   : > { %v956_v45 = vpop.f32.mrf.mxu0  ;;  %v1118_v46 = vpop.f32.mrf.mxu1 }
 0x12d   : > { %v1215_v48 = vmax.f32 %v1183_v42, %v1199_v43  ;;  %v1197_v49 = vmax.f32 %v956_v45, %v1118_v46 }
 0x12e   : > { %v1580_v50 = vpop.f32.mrf.mxu0  ;;  %v1612_v51 = vpop.f32.mrf.mxu1 }
 0x12f   : > { %v1238_v53 = vadd.f32 %v1999_v44, %v1215_v48  ;;  %v1213_v54 = vmax.f32 %v1181_v47, %v1197_v49  ;;  %v1200_v55 = vmax.f32 %v1580_v50, %v1612_v51 }
 0x130   : > { %v959_v56 = vpop.f32.mrf.mxu0  ;;  %v1121_v57 = vpop.f32.mrf.mxu1 }
 0x131   : > { %1254 = vst [vmem:[%s2004_s28 + $0x10] sm:$0xff] %v1238_v53  ;;  %v1236_v59 = vadd.f32 %v1999_v44, %v1213_v54  ;;  %v1216_v60 = vmax.f32 %v1184_v52, %v1200_v55  ;;  %v1198_v61 = vmax.f32 %v959_v56, %v1121_v57 }
 0x132   : > { %v1583_v62 = vpop.f32.mrf.mxu0  ;;  %v1615_v63 = vpop.f32.mrf.mxu1 }
 0x133   : > { %1252 = vst [vmem:[%s2004_s28] sm:$0xff] %v1236_v59  ;;  %v1239_v1 = vadd.f32 %v1999_v44, %v1216_v60  ;;  %v1214_v2 = vmax.f32 %v1182_v58, %v1198_v61  ;;  %v1203_v3 = vmax.f32 %v1583_v62, %v1615_v63 }
 0x134   : > { %v972_v4 = vpop.f32.mrf.mxu0  ;;  %v1134_v5 = vpop.f32.mrf.mxu1 }
 0x135   : > { %1255 = vst [vmem:[%s2004_s28 + $0x18] sm:$0xff] %v1239_v1  ;;  %v1237_v7 = vadd.f32 %v1999_v44, %v1214_v2  ;;  %v1219_v8 = vmax.f32 %v1187_v0, %v1203_v3  ;;  %v1201_v9 = vmax.f32 %v972_v4, %v1134_v5 }
 0x136   : > { %v1584_v10 = vpop.f32.mrf.mxu0  ;;  %v1616_v11 = vpop.f32.mrf.mxu1 }
 0x137   : > { %1253 = vst [vmem:[%s2004_s28 + $0x8] sm:$0xff] %v1237_v7  ;;  %v1242_v13 = vadd.f32 %v1999_v44, %v1219_v8  ;;  %v1217_v14 = vmax.f32 %v1185_v6, %v1201_v9  ;;  %v1204_v15 = vmax.f32 %v1584_v10, %v1616_v11 }
 0x138   : > { %v975_v16 = vpop.f32.mrf.mxu0  ;;  %v1137_v17 = vpop.f32.mrf.mxu1 }
 0x139   : > { %1258 = vst [vmem:[%s2004_s28 + $0x30] sm:$0xff] %v1242_v13  ;;  %v1240_v19 = vadd.f32 %v1999_v44, %v1217_v14  ;;  %v1220_v40 = vmax.f32 %v1188_v12, %v1204_v15  ;;  %v1202_v41 = vmax.f32 %v975_v16, %v1137_v17 }
 0x13a   : > { %v1587_v42 = vpop.f32.mrf.mxu0  ;;  %v1619_v43 = vpop.f32.mrf.mxu1 }
 0x13b   : > { %1256 = vst [vmem:[%s2004_s28 + $0x20] sm:$0xff] %v1240_v19  ;;  %v1243_v21 = vadd.f32 %v1999_v44, %v1220_v40  ;;  %v1218_v45 = vmax.f32 %v1186_v18, %v1202_v41  ;;  %v1207_v46 = vmax.f32 %v1587_v42, %v1619_v43 }
 0x13c   : > { %v988_v47 = vpop.f32.mrf.mxu0  ;;  %v1150_v48 = vpop.f32.mrf.mxu1 }
 0x13d   : > { %1259 = vst [vmem:[%s2004_s28 + $0x38] sm:$0xff] %v1243_v21  ;;  %v1241_v23 = vadd.f32 %v1999_v44, %v1218_v45  ;;  %v1223_v49 = vmax.f32 %v1191_v20, %v1207_v46  ;;  %v1205_v50 = vmax.f32 %v988_v47, %v1150_v48 }
 0x13e   : > { %v1588_v51 = vpop.f32.mrf.mxu0  ;;  %v1620_v52 = vpop.f32.mrf.mxu1 }
 0x13f   : > { %1257 = vst [vmem:[%s2004_s28 + $0x28] sm:$0xff] %v1241_v23  ;;  %v1246_v25 = vadd.f32 %v1999_v44, %v1223_v49  ;;  %v1221_v53 = vmax.f32 %v1189_v22, %v1205_v50  ;;  %v1208_v54 = vmax.f32 %v1588_v51, %v1620_v52 }
 0x140   : > { %v991_v55 = vpop.f32.mrf.mxu0  ;;  %v1153_v56 = vpop.f32.mrf.mxu1 }
 0x141   : > { %1262 = vst [vmem:[%s2004_s28 + $0x50] sm:$0xff] %v1246_v25  ;;  %v1244_v27 = vadd.f32 %v1999_v44, %v1221_v53  ;;  %v1224_v57 = vmax.f32 %v1192_v24, %v1208_v54  ;;  %v1206_v58 = vmax.f32 %v991_v55, %v1153_v56 }
 0x142   : > { %v1591_v59 = vpop.f32.mrf.mxu0  ;;  %v1623_v60 = vpop.f32.mrf.mxu1 }
 0x143   : > { %1260 = vst [vmem:[%s2004_s28 + $0x40] sm:$0xff] %v1244_v27  ;;  %v1247_v29 = vadd.f32 %v1999_v44, %v1224_v57  ;;  %v1222_v61 = vmax.f32 %v1190_v26, %v1206_v58  ;;  %v1211_v62 = vmax.f32 %v1591_v59, %v1623_v60 }
 0x144   : > { %v1004_v63 = vpop.f32.mrf.mxu0  ;;  %v1166_v0 = vpop.f32.mrf.mxu1 }
 0x145   : > { %1263 = vst [vmem:[%s2004_s28 + $0x58] sm:$0xff] %v1247_v29  ;;  %v1245_v31 = vadd.f32 %v1999_v44, %v1222_v61  ;;  %v1227_v1 = vmax.f32 %v1195_v28, %v1211_v62  ;;  %v1209_v2 = vmax.f32 %v1004_v63, %v1166_v0 }
 0x146   : > { %v1592_v3 = vpop.f32.mrf.mxu0  ;;  %v1624_v4 = vpop.f32.mrf.mxu1 }
 0x147   : > { %1261 = vst [vmem:[%s2004_s28 + $0x48] sm:$0xff] %v1245_v31  ;;  %v1250_v33 = vadd.f32 %v1999_v44, %v1227_v1  ;;  %v1225_v5 = vmax.f32 %v1193_v30, %v1209_v2  ;;  %v1212_v6 = vmax.f32 %v1592_v3, %v1624_v4 }
 0x148   : > { %v1007_v7 = vpop.f32.mrf.mxu0  ;;  %v1169_v34 = vpop.f32.mrf.mxu1 }
 0x149   : > { %1266 = vst [vmem:[%s2004_s28 + $0x70] sm:$0xff] %v1250_v33  ;;  %v1248_v8 = vadd.f32 %v1999_v44, %v1225_v5  ;;  %v1228_v9 = vmax.f32 %v1196_v32, %v1212_v6  ;;  %v1210_v10 = vmax.f32 %v1007_v7, %v1169_v34 }
 0x14b   : > { %1264 = vst [vmem:[%s2004_s28 + $0x60] sm:$0xff] %v1248_v8  ;;  %v1251_v11 = vadd.f32 %v1999_v44, %v1228_v9  ;;  %v1226_v36 = vmax.f32 %v1194_v35, %v1210_v10 }
 0x14d   : > { %1267 = vst [vmem:[%s2004_s28 + $0x78] sm:$0xff] %v1251_v11  ;;  %v1249_v37 = vadd.f32 %v1999_v44, %v1226_v36 }
 0x14f   : > { %1265 = vst [vmem:[%s2004_s28 + $0x68] sm:$0xff] %v1249_v37 }
 0x150 PF: > { %p10_p9 = scmp.ge.s32.totalorder %s1750_s16, 6   ;;  %s2076_s12 = smov %s1707_s13 }
 0x151   : > { %s2077_s13 = smov %s1759_s19  ;;  %s2078_s14 = smov %s1750_s16 }
 0x152   :  { %12 = sbr.rel (!%p10_p9) target bundleno = 2 (0x2), region = 111 }

// kernel: lenet_forward.4
= control target key start
LH: loop header
LB: loop body
LE: loop exit
PB: predicated region body
PF: predicated region fallthrough
CT: control target
= control target key end

     0   :  { %s1201_s1 = inlined_call_operand.vmem [shape: bf16[256,128], index: 1, kind: input, shape index: {}]   ;;  %s1202_s0 = inlined_call_operand.vmem [shape: bf16[4,56,256], index: 0, kind: input, shape index: {}]   ;;  %s1203_s2 = inlined_call_operand.vmem [shape: f32[1,128], index: 2, kind: input, shape index: {}]   ;;  %s1204_s3 = inlined_call_operand.vmem [shape: f32[56,128], index: 3, kind: output, shape index: {}]  }
   0x1   :  { %v854_v0 = vld [vmem:[%s1201_s1 + $0x78] sm:$0xff]   ;;  %v856_v2 = vld [vmem:[%s1201_s1 + $0x70] sm:$0xff]   ;;  %v858_v4 = vld [vmem:[%s1201_s1 + $0x68] sm:$0xff]  }
   0x2   :  { %v855_v1 = vld [vmem:[%s1201_s1 + $0x38] sm:$0xff]   ;;  %694 = vmatprep.subr.bf16.mxu0 %v854_v0  ;;  %734 = vmatprep.subr.bf16.mxu1 %v854_v0  ;;  %v857_v3 = vld [vmem:[%s1201_s1 + $0x30] sm:$0xff]   ;;  %v952_v5 = vld [vmem:[%s1201_s1 + $0x28] sm:$0xff]  }
   0x3   :  { %695 = vmatpush3.bf16.msra.mxu0 %v855_v1  ;;  %735 = vmatpush3.bf16.msra.mxu1 %v855_v1  ;;  %v957_v6 = vld [vmem:[%s1201_s1 + $0x60] sm:$0xff]   ;;  %v971_v8 = vld [vmem:[%s1201_s1 + $0x58] sm:$0xff]   ;;  %v985_v10 = vld [vmem:[%s1201_s1 + $0x50] sm:$0xff]  }
   0x4   :  { %696 = vmatprep.subr.bf16.mxu0 %v856_v2  ;;  %736 = vmatprep.subr.bf16.mxu1 %v856_v2  ;;  %v964_v7 = vld [vmem:[%s1201_s1 + $0x20] sm:$0xff]   ;;  %v978_v9 = vld [vmem:[%s1201_s1 + $0x18] sm:$0xff]   ;;  %v998_v13 = vld [vmem:[%s1201_s1 + $0x10] sm:$0xff]  }
   0x5   :  { %v872_v11 = vld [vmem:[%s1202_s0 + $0x4] ss:$8 sps:$4 sm:$0xff]   ;;  %v870_v18 = vld [vmem:[%s1202_s0] ss:$8 sps:$4 sm:$0xff]   ;;  %v876_v20 = vld [vmem:[%s1202_s0 + $0x14] ss:$8 sps:$4 sm:$0xff]  }
   0x6   :  { %v875_v12 = vld [vmem:[%s1202_s0 + $0x3c] ss:$8 sps:$4 sm:$0xff]   ;;  %v1005_v14 = vld [vmem:[%s1201_s1 + $0x48] sm:$0xff]   ;;  %219 = vmatprep.mubr.bf16.mxu0 %v872_v11  ;;  %v873_v19 = vld [vmem:[%s1202_s0 + $0x38] ss:$8 sps:$4 sm:$0xff]  }
   0x7   :  { %697 = vmatpush3.bf16.msra.mxu0 %v857_v3  ;;  %737 = vmatpush3.bf16.msra.mxu1 %v857_v3  ;;  %v1012_v15 = vld [vmem:[%s1201_s1 + $0x8] sm:$0xff]   ;;  %v1019_v16 = vld [vmem:[%s1201_s1 + $0x40] sm:$0xff]   ;;  %v880_v22 = vld [vmem:[%s1202_s0 + $0x10] ss:$8 sps:$4 sm:$0xff]  }
   0x8   :  { %698 = vmatprep.subr.bf16.mxu0 %v858_v4  ;;  %738 = vmatprep.subr.bf16.mxu1 %v858_v4  ;;  %v1026_v17 = vld [vmem:[%s1201_s1] sm:$0xff]   ;;  %v878_v21 = vld [vmem:[%s1202_s0 + $0x4c] ss:$8 sps:$4 sm:$0xff]   ;;  %v881_v23 = vld [vmem:[%s1202_s0 + $0x48] ss:$8 sps:$4 sm:$0xff]  }
   0x9   :  { %328 = vmatprep.mubr.bf16.mxu1 %v875_v12  ;;  %v882_v24 = vld [vmem:[%s1202_s0 + $0x24] ss:$8 sps:$4 sm:$0xff]   ;;  %v886_v26 = vld [vmem:[%s1202_s0 + $0x20] ss:$8 sps:$4 sm:$0xff]   ;;  %v53_v28 = vld [vmem:[%s1202_s0 + $0x30] sm:$0xff] }
   0xa   :  { %v884_v25 = vld [vmem:[%s1202_s0 + $0x5c] ss:$8 sps:$4 sm:$0xff]   ;;  %v887_v27 = vld [vmem:[%s1202_s0 + $0x58] ss:$8 sps:$4 sm:$0xff]   ;;  %v654_v29 = vld [vmem:[%s1202_s0 + $0x68] sm:$0xff]  ;;  %v631_v30 = vcombine.high %v53_v28, %v53_v28  ;;  %v630_v32 = vcombine.low %v53_v28, %v53_v28 }
   0xb   :  { %699 = vmatpush3.bf16.msra.mxu0 %v952_v5  ;;  %739 = vmatpush3.bf16.msra.mxu1 %v952_v5  ;;  %v662_v31 = vcombine.high %v654_v29, %v654_v29  ;;  %v661_v33 = vcombine.low %v654_v29, %v654_v29  ;;  %v894_v34 = vld [vmem:[%s1202_s0 + $0x74] ss:$8 sps:$4 sm:$0xff]   ;;  %v892_v36 = vld [vmem:[%s1202_s0 + $0x70] ss:$8 sps:$4 sm:$0xff]   ;;  %v898_v38 = vld [vmem:[%s1202_s0 + $0x84] ss:$8 sps:$4 sm:$0xff]  }
   0xc   :  { %700 = vmatprep.subr.bf16.mxu0 %v957_v6  ;;  %740 = vmatprep.subr.bf16.mxu1 %v957_v6  ;;  %v897_v35 = vld [vmem:[%s1202_s0 + $0xac] ss:$8 sps:$4 sm:$0xff]   ;;  %v895_v37 = vld [vmem:[%s1202_s0 + $0xa8] ss:$8 sps:$4 sm:$0xff]   ;;  %v900_v39 = vld [vmem:[%s1202_s0 + $0xbc] ss:$8 sps:$4 sm:$0xff]  }
   0xd   :  { %v902_v40 = vld [vmem:[%s1202_s0 + $0x80] ss:$8 sps:$4 sm:$0xff]   ;;  %v904_v42 = vld [vmem:[%s1202_s0 + $0x94] ss:$8 sps:$4 sm:$0xff]   ;;  %v908_v46 = vld [vmem:[%s1202_s0 + $0x90] ss:$8 sps:$4 sm:$0xff]  }
   0xe   :  { %v903_v41 = vld [vmem:[%s1202_s0 + $0xb8] ss:$8 sps:$4 sm:$0xff]   ;;  %v906_v43 = vld [vmem:[%s1202_s0 + $0xcc] ss:$8 sps:$4 sm:$0xff]   ;;  %v909_v47 = vld [vmem:[%s1202_s0 + $0xc8] ss:$8 sps:$4 sm:$0xff]  }
   0xf   :  { %701 = vmatpush3.bf16.msra.mxu0 %v964_v7  ;;  %741 = vmatpush3.bf16.msra.mxu1 %v964_v7  ;;  %v669_v44 = vld [vmem:[%s1202_s0 + $0xa0] sm:$0xff]  ;;  %v684_v45 = vld [vmem:[%s1202_s0 + $0xd8] sm:$0xff] }
  0x10   :  { %702 = vmatprep.subr.bf16.mxu0 %v971_v8  ;;  %742 = vmatprep.subr.bf16.mxu1 %v971_v8  ;;  %v677_v48 = vcombine.high %v669_v44, %v669_v44  ;;  %v692_v49 = vcombine.high %v684_v45, %v684_v45  ;;  %v676_v50 = vcombine.low %v669_v44, %v669_v44 }
  0x11   :  { %v691_v51 = vcombine.low %v684_v45, %v684_v45 }
  0x13   :  { %703 = vmatpush3.bf16.msra.mxu0 %v978_v9  ;;  %743 = vmatpush3.bf16.msra.mxu1 %v978_v9 }
  0x14   :  { %704 = vmatprep.subr.bf16.mxu0 %v985_v10  ;;  %744 = vmatprep.subr.bf16.mxu1 %v985_v10 }
  0x17   :  { %705 = vmatpush3.bf16.msra.mxu0 %v998_v13  ;;  %745 = vmatpush3.bf16.msra.mxu1 %v998_v13 }
  0x18   :  { %706 = vmatprep.subr.bf16.mxu0 %v1005_v14  ;;  %746 = vmatprep.subr.bf16.mxu1 %v1005_v14 }
  0x1b   :  { %707 = vmatpush3.bf16.msra.mxu0 %v1012_v15  ;;  %747 = vmatpush3.bf16.msra.mxu1 %v1012_v15 }
  0x1c   :  { %708 = vmatprep.subr.bf16.mxu0 %v1019_v16  ;;  %748 = vmatprep.subr.bf16.mxu1 %v1019_v16 }
  0x1f   :  { %709 = vmatpush3.bf16.msra.mxu0 %v1026_v17  ;;  %749 = vmatpush3.bf16.msra.mxu1 %v1026_v17 }
  0x20   :  { %774 = vmatprep.subr.bf16.mxu0 %v854_v0  ;;  %814 = vmatprep.subr.bf16.mxu1 %v854_v0 }
  0x22   :  { %220 = vmatmul.mubr.bf16.vlgmr.msra.gmra.mxu0 %v870_v18  ;;  %329 = vmatmul.mubr.bf16.vlgmr.msra.gmra.mxu1 %v873_v19 }
  0x23   :  { %775 = vmatpush3.bf16.msra.mxu0 %v855_v1  ;;  %815 = vmatpush3.bf16.msra.mxu1 %v855_v1 }
  0x24   :  { %776 = vmatprep.subr.bf16.mxu0 %v856_v2  ;;  %816 = vmatprep.subr.bf16.mxu1 %v856_v2 }
  0x25   :  { %227 = vmatprep.mubr.bf16.mxu0 %v876_v20  ;;  %336 = vmatprep.mubr.bf16.mxu1 %v878_v21 }
  0x27   :  { %777 = vmatpush3.bf16.msra.mxu0 %v857_v3  ;;  %817 = vmatpush3.bf16.msra.mxu1 %v857_v3 }
  0x28   :  { %778 = vmatprep.subr.bf16.mxu0 %v858_v4  ;;  %818 = vmatprep.subr.bf16.mxu1 %v858_v4 }
  0x2a   :  { %228 = vmatmul.mubr.bf16.gmra.mxu0 %v880_v22  ;;  %337 = vmatmul.mubr.bf16.gmra.mxu1 %v881_v23 }
  0x2b   :  { %779 = vmatpush3.bf16.msra.mxu0 %v952_v5  ;;  %819 = vmatpush3.bf16.msra.mxu1 %v952_v5 }
  0x2c   :  { %780 = vmatprep.subr.bf16.mxu0 %v957_v6  ;;  %820 = vmatprep.subr.bf16.mxu1 %v957_v6 }
  0x2d   :  { %235 = vmatprep.mubr.bf16.mxu0 %v882_v24  ;;  %344 = vmatprep.mubr.bf16.mxu1 %v884_v25 }
  0x2f   :  { %781 = vmatpush3.bf16.msra.mxu0 %v964_v7  ;;  %821 = vmatpush3.bf16.msra.mxu1 %v964_v7 }
  0x30   :  { %782 = vmatprep.subr.bf16.mxu0 %v971_v8  ;;  %822 = vmatprep.subr.bf16.mxu1 %v971_v8 }
  0x32   :  { %236 = vmatmul.mubr.bf16.gmra.mxu0 %v886_v26  ;;  %345 = vmatmul.mubr.bf16.gmra.mxu1 %v887_v27 }
  0x33   :  { %783 = vmatpush3.bf16.msra.mxu0 %v978_v9  ;;  %823 = vmatpush3.bf16.msra.mxu1 %v978_v9 }
  0x34   :  { %784 = vmatprep.subr.bf16.mxu0 %v985_v10  ;;  %824 = vmatprep.subr.bf16.mxu1 %v985_v10 }
  0x35   :  { %243 = vmatprep.mubr.bf16.mxu0 %v631_v30  ;;  %352 = vmatprep.mubr.bf16.mxu1 %v662_v31 }
  0x37   :  { %785 = vmatpush3.bf16.msra.mxu0 %v998_v13  ;;  %825 = vmatpush3.bf16.msra.mxu1 %v998_v13 }
  0x38   :  { %786 = vmatprep.subr.bf16.mxu0 %v1005_v14  ;;  %826 = vmatprep.subr.bf16.mxu1 %v1005_v14 }
  0x3a   :  { %244 = vmatmul.mubr.bf16.gmra.mxu0 %v630_v32  ;;  %353 = vmatmul.mubr.bf16.gmra.mxu1 %v661_v33 }
  0x3b   :  { %787 = vmatpush3.bf16.msra.mxu0 %v1012_v15  ;;  %827 = vmatpush3.bf16.msra.mxu1 %v1012_v15 }
  0x3c   :  { %788 = vmatprep.subr.bf16.mxu0 %v1019_v16  ;;  %828 = vmatprep.subr.bf16.mxu1 %v1019_v16 }
  0x3d   :  { %437 = vmatprep.mubr.bf16.mxu0 %v894_v34  ;;  %546 = vmatprep.mubr.bf16.mxu1 %v897_v35  ;;  %v1159_v34 = vld [vmem:[%s1203_s2] ss:$0 sm:$0xff] }
  0x3f   :  { %789 = vmatpush3.bf16.msra.mxu0 %v1026_v17  ;;  %829 = vmatpush3.bf16.msra.mxu1 %v1026_v17 }
  0x42   :  { %438 = vmatmul.mubr.bf16.vlgmr.msra.gmra.mxu0 %v892_v36  ;;  %547 = vmatmul.mubr.bf16.vlgmr.msra.gmra.mxu1 %v895_v37 }
  0x43   :  { %445 = vmatprep.mubr.bf16.mxu0 %v898_v38  ;;  %554 = vmatprep.mubr.bf16.mxu1 %v900_v39 }
  0x4a   :  { %446 = vmatmul.mubr.bf16.gmra.mxu0 %v902_v40  ;;  %555 = vmatmul.mubr.bf16.gmra.mxu1 %v903_v41 }
  0x4b   :  { %453 = vmatprep.mubr.bf16.mxu0 %v904_v42  ;;  %562 = vmatprep.mubr.bf16.mxu1 %v906_v43 }
  0x52   :  { %454 = vmatmul.mubr.bf16.gmra.mxu0 %v908_v46  ;;  %563 = vmatmul.mubr.bf16.gmra.mxu1 %v909_v47 }
  0x53   :  { %461 = vmatprep.mubr.bf16.mxu0 %v677_v48  ;;  %570 = vmatprep.mubr.bf16.mxu1 %v692_v49 }
  0x5a   :  { %462 = vmatmul.mubr.bf16.gmra.mxu0 %v676_v50  ;;  %571 = vmatmul.mubr.bf16.gmra.mxu1 %v691_v51 }
  0xe2   :  { %v710_v52 = vpop.f32.mrf.mxu0  ;;  %v750_v53 = vpop.f32.mrf.mxu1 }
  0xe4   :  { %v711_v54 = vpop.f32.mrf.mxu0  ;;  %v751_v55 = vpop.f32.mrf.mxu1 }
  0xe5   :  { %v712_v22 = vadd.f32 %v711_v54, %v710_v52  ;;  %v752_v23 = vadd.f32 %v751_v55, %v750_v53 }
  0xe6   :  { %v713_v56 = vpop.f32.mrf.mxu0  ;;  %v753_v57 = vpop.f32.mrf.mxu1 }
  0xe7   :  { %v578_v32 = vmax.f32 %v712_v22, %v752_v23 }
  0xe8   :  { %v714_v58 = vpop.f32.mrf.mxu0  ;;  %v754_v59 = vpop.f32.mrf.mxu1 }
  0xe9   :  { %v715_v28 = vadd.f32 %v714_v58, %v713_v56  ;;  %v755_v29 = vadd.f32 %v754_v59, %v753_v57 }
  0xea   :  { %v716_v60 = vpop.f32.mrf.mxu0  ;;  %v756_v61 = vpop.f32.mrf.mxu1 }
  0xeb   :  { %v579_v40 = vmax.f32 %v715_v28, %v755_v29 }
  0xec   :  { %v717_v62 = vpop.f32.mrf.mxu0  ;;  %v757_v63 = vpop.f32.mrf.mxu1 }
  0xed   :  { %v718_v43 = vadd.f32 %v717_v62, %v716_v60  ;;  %v758_v44 = vadd.f32 %v757_v63, %v756_v61 }
  0xee   :  { %v719_v0 = vpop.f32.mrf.mxu0  ;;  %v759_v1 = vpop.f32.mrf.mxu1 }
  0xef   :  { %v580_v56 = vmax.f32 %v718_v43, %v758_v44 }
  0xf0   :  { %v720_v2 = vpop.f32.mrf.mxu0  ;;  %v760_v3 = vpop.f32.mrf.mxu1 }
  0xf1   :  { %v721_v52 = vadd.f32 %v720_v2, %v719_v0  ;;  %v761_v53 = vadd.f32 %v760_v3, %v759_v1 }
  0xf2   :  { %v1132_v4 = vpop.f32.mrf.mxu0  ;;  %v1134_v5 = vpop.f32.mrf.mxu1 }
  0xf4   :  { %v1136_v6 = vpop.f32.mrf.mxu0  ;;  %v1138_v7 = vpop.f32.mrf.mxu1 }
  0xf5   :  { %v724_v0 = vadd.f32 %v1136_v6, %v1132_v4  ;;  %v764_v1 = vadd.f32 %v1138_v7, %v1134_v5 }
  0xf6   :  { %v1140_v8 = vpop.f32.mrf.mxu0  ;;  %v1142_v9 = vpop.f32.mrf.mxu1 }
  0xf7   :  { %v582_v7 = vmax.f32 %v724_v0, %v764_v1 }
  0xf8   :  { %v1144_v10 = vpop.f32.mrf.mxu0  ;;  %v1146_v11 = vpop.f32.mrf.mxu1 }
  0xf9   :  { %v767_v4 = vadd.f32 %v1146_v11, %v1142_v9 }
  0xfa   :  { %v1148_v12 = vpop.f32.mrf.mxu0  ;;  %v1150_v13 = vpop.f32.mrf.mxu1 }
  0xfc   :  { %v1152_v14 = vpop.f32.mrf.mxu0  ;;  %v1154_v15 = vpop.f32.mrf.mxu1 }
  0xfd   :  { %v730_v9 = vadd.f32 %v1152_v14, %v1148_v12  ;;  %v770_v11 = vadd.f32 %v1154_v15, %v1150_v13 }
  0xfe   :  { %v731_v16 = vpop.f32.mrf.mxu0  ;;  %v771_v17 = vpop.f32.mrf.mxu1 }
  0xff   :  { %v581_v16 = vmax.f32 %v721_v52, %v761_v53  ;;  %v584_v43 = vmax.f32 %v730_v9, %v770_v11 }
 0x100   :  { %v732_v18 = vpop.f32.mrf.mxu0  ;;  %v772_v19 = vpop.f32.mrf.mxu1 }
 0x102   :  { %v790_v20 = vpop.f32.mrf.mxu0  ;;  %v830_v21 = vpop.f32.mrf.mxu1 }
 0x104   :  { %v791_v24 = vpop.f32.mrf.mxu0  ;;  %v831_v25 = vpop.f32.mrf.mxu1 }
 0x105   :  { %v792_v26 = vadd.f32 %v791_v24, %v790_v20  ;;  %v832_v27 = vadd.f32 %v831_v25, %v830_v21  ;;  %v727_v24 = vadd.f32 %v1144_v10, %v1140_v8 }
 0x106   :  { %v793_v30 = vpop.f32.mrf.mxu0  ;;  %v833_v31 = vpop.f32.mrf.mxu1 }
 0x107   :  { %v585_v33 = vmax.f32 %v792_v26, %v832_v27 }
 0x108   :  { %v794_v35 = vpop.f32.mrf.mxu0  ;;  %v834_v36 = vpop.f32.mrf.mxu1 }
 0x109   :  { %v592_v37 = vmax.f32 %v578_v32, %v585_v33  ;;  %v795_v38 = vadd.f32 %v794_v35, %v793_v30  ;;  %v835_v39 = vadd.f32 %v834_v36, %v833_v31  ;;  %v583_v32 = vmax.f32 %v727_v24, %v767_v4 }
 0x10a   :  { %v796_v41 = vpop.f32.mrf.mxu0  ;;  %v836_v42 = vpop.f32.mrf.mxu1 }
 0x10b   :  { %v606_v45 = vadd.f32 %v1159_v34, %v592_v37  ;;  %v586_v46 = vmax.f32 %v795_v38, %v835_v39 }
 0x10c   :  { %v797_v47 = vpop.f32.mrf.mxu0  ;;  %v837_v48 = vpop.f32.mrf.mxu1 }
 0x10d   :  { %613 = vst [vmem:[%s1204_s3] sm:$0xff] %v606_v45  ;;  %v593_v49 = vmax.f32 %v579_v40, %v586_v46  ;;  %v798_v50 = vadd.f32 %v797_v47, %v796_v41  ;;  %v838_v51 = vadd.f32 %v837_v48, %v836_v42 }
 0x10e   :  { %v799_v54 = vpop.f32.mrf.mxu0  ;;  %v839_v55 = vpop.f32.mrf.mxu1 }
 0x10f   :  { %v607_v57 = vadd.f32 %v1159_v34, %v593_v49  ;;  %v587_v58 = vmax.f32 %v798_v50, %v838_v51 }
 0x110   :  { %v800_v59 = vpop.f32.mrf.mxu0  ;;  %v840_v60 = vpop.f32.mrf.mxu1 }
 0x111   :  { %614 = vst [vmem:[%s1204_s3 + $0x8] sm:$0xff] %v607_v57  ;;  %v594_v61 = vmax.f32 %v580_v56, %v587_v58  ;;  %v801_v62 = vadd.f32 %v800_v59, %v799_v54  ;;  %v841_v63 = vadd.f32 %v840_v60, %v839_v55 }
 0x112   :  { %v802_v17 = vpop.f32.mrf.mxu0  ;;  %v842_v18 = vpop.f32.mrf.mxu1 }
 0x113   :  { %v608_v2 = vadd.f32 %v1159_v34, %v594_v61  ;;  %v588_v3 = vmax.f32 %v801_v62, %v841_v63 }
 0x114   :  { %v803_v19 = vpop.f32.mrf.mxu0  ;;  %v843_v20 = vpop.f32.mrf.mxu1 }
 0x115   :  { %615 = vst [vmem:[%s1204_s3 + $0x10] sm:$0xff] %v608_v2  ;;  %v595_v21 = vmax.f32 %v581_v16, %v588_v3  ;;  %v804_v22 = vadd.f32 %v803_v19, %v802_v17  ;;  %v844_v23 = vadd.f32 %v843_v20, %v842_v18 }
 0x116   :  { %v805_v6 = vpop.f32.mrf.mxu0  ;;  %v845_v5 = vpop.f32.mrf.mxu1 }
 0x117   :  { %v609_v25 = vadd.f32 %v1159_v34, %v595_v21  ;;  %v589_v26 = vmax.f32 %v804_v22, %v844_v23 }
 0x118   :  { %v806_v27 = vpop.f32.mrf.mxu0  ;;  %v846_v28 = vpop.f32.mrf.mxu1 }
 0x119   :  { %616 = vst [vmem:[%s1204_s3 + $0x18] sm:$0xff] %v609_v25  ;;  %v596_v29 = vmax.f32 %v582_v7, %v589_v26  ;;  %v807_v30 = vadd.f32 %v806_v27, %v805_v6  ;;  %v847_v31 = vadd.f32 %v846_v28, %v845_v5 }
 0x11a   :  { %v808_v8 = vpop.f32.mrf.mxu0  ;;  %v848_v10 = vpop.f32.mrf.mxu1 }
 0x11b   :  { %v610_v33 = vadd.f32 %v1159_v34, %v596_v29  ;;  %v590_v35 = vmax.f32 %v807_v30, %v847_v31 }
 0x11c   :  { %v809_v36 = vpop.f32.mrf.mxu0  ;;  %v849_v37 = vpop.f32.mrf.mxu1 }
 0x11d   :  { %617 = vst [vmem:[%s1204_s3 + $0x20] sm:$0xff] %v610_v33  ;;  %v597_v38 = vmax.f32 %v583_v32, %v590_v35  ;;  %v810_v39 = vadd.f32 %v809_v36, %v808_v8  ;;  %v850_v40 = vadd.f32 %v849_v37, %v848_v10 }
 0x11e   :  { %v811_v41 = vpop.f32.mrf.mxu0  ;;  %v851_v42 = vpop.f32.mrf.mxu1 }
 0x11f   :  { %v611_v12 = vadd.f32 %v1159_v34, %v597_v38  ;;  %v591_v14 = vmax.f32 %v810_v39, %v850_v40 }
 0x120   :  { %v812_v44 = vpop.f32.mrf.mxu0  ;;  %v852_v13 = vpop.f32.mrf.mxu1 }
 0x121   :  { %618 = vst [vmem:[%s1204_s3 + $0x28] sm:$0xff] %v611_v12  ;;  %v598_v15 = vmax.f32 %v584_v43, %v591_v14 }
 0x123   :  { %v612_v45 = vadd.f32 %v1159_v34, %v598_v15 }
 0x125   :  { %619 = vst [vmem:[%s1204_s3 + $0x30] sm:$0xff] %v612_v45 }

// kernel: lenet_forward.5
= control target key start
LH: loop header
LB: loop body
LE: loop exit
PB: predicated region body
PF: predicated region fallthrough
CT: control target
= control target key end

     0   :  { %vm3323_vm0 = vmmov 0   ;;  %s4093_s1 = inlined_call_operand.vmem [shape: bf16[3200,128], index: 1, kind: input, shape index: {}]   ;;  %s4094_s0 = inlined_call_operand.vmem [shape: bf16[8,3200], index: 0, kind: input, shape index: {}]   ;;  %s4095_s2 = inlined_call_operand.vmem [shape: f32[1,128], index: 2, kind: input, shape index: {}]   ;;  %s4096_s3 = inlined_call_operand.vmem [shape: bf16[128,128], index: 3, kind: input, shape index: {}]   ;;  %s4097_s5 = inlined_call_operand.vmem [shape: bf16[128,128], index: 5, kind: input, shape index: {}]   ;;  %s4098_s4 = inlined_call_operand.vmem [shape: f32[1,128], index: 4, kind: input, shape index: {}]   ;;  %s4099_s6 = inlined_call_operand.vmem [shape: f32[1,128], index: 6, kind: input, shape index: {}]   ;;  %s4100_s7 = inlined_call_operand.vmem [shape: f32[8,128], index: 7, kind: output, shape index: {}]  }
   0x1   :  { %v3081_v0 = vld [vmem:[%s4093_s1 + $0x78] sm:$0xff]   ;;  %v3085_v4 = vld [vmem:[%s4093_s1 + $0x70] sm:$0xff]   ;;  %v3089_v8 = vld [vmem:[%s4093_s1 + $0x68] sm:$0xff]  }
   0x2   :  { %v3082_v1 = vld [vmem:[%s4093_s1 + $0x38] sm:$0xff]   ;;  %2728 = vmatprep.subr.bf16.mxu0 %v3081_v0  ;;  %v3086_v5 = vld [vmem:[%s4093_s1 + $0x30] sm:$0xff]   ;;  %v3090_v9 = vld [vmem:[%s4093_s1 + $0x28] sm:$0xff]  }
   0x3   :  { %v3083_v2 = vld [vmem:[%s4093_s1 + $0xf8] sm:$0xff]   ;;  %2729 = vmatpush3.bf16.msra.mxu0 %v3082_v1  ;;  %v3087_v6 = vld [vmem:[%s4093_s1 + $0xf0] sm:$0xff]   ;;  %v3091_v10 = vld [vmem:[%s4093_s1 + $0xe8] sm:$0xff]  }
   0x4   :  { %v3084_v3 = vld [vmem:[%s4093_s1 + $0xb8] sm:$0xff]   ;;  %2750 = vmatprep.subr.bf16.mxu1 %v3083_v2  ;;  %2730 = vmatprep.subr.bf16.mxu0 %v3085_v4  ;;  %v3088_v7 = vld [vmem:[%s4093_s1 + $0xb0] sm:$0xff]   ;;  %v3092_v11 = vld [vmem:[%s4093_s1 + $0xa8] sm:$0xff]  }
   0x5   :  { %2751 = vmatpush3.bf16.msra.mxu1 %v3084_v3  ;;  %v3093_v12 = vld [vmem:[%s4093_s1 + $0x60] sm:$0xff]   ;;  %v3097_v16 = vld [vmem:[%s4093_s1 + $0x58] sm:$0xff]   ;;  %v3101_v20 = vld [vmem:[%s4093_s1 + $0x50] sm:$0xff]  }
   0x6   :  { %2752 = vmatprep.subr.bf16.mxu1 %v3087_v6  ;;  %v3094_v13 = vld [vmem:[%s4093_s1 + $0x20] sm:$0xff]   ;;  %v3098_v17 = vld [vmem:[%s4093_s1 + $0x18] sm:$0xff]   ;;  %v3102_v21 = vld [vmem:[%s4093_s1 + $0x10] sm:$0xff]  }
   0x7   :  { %2731 = vmatpush3.bf16.msra.mxu0 %v3086_v5  ;;  %v3095_v14 = vld [vmem:[%s4093_s1 + $0xe0] sm:$0xff]   ;;  %v3099_v18 = vld [vmem:[%s4093_s1 + $0xd8] sm:$0xff]   ;;  %v3103_v22 = vld [vmem:[%s4093_s1 + $0xd0] sm:$0xff]  }
   0x8   :  { %2732 = vmatprep.subr.bf16.mxu0 %v3089_v8  ;;  %v3096_v15 = vld [vmem:[%s4093_s1 + $0xa0] sm:$0xff]   ;;  %v3100_v19 = vld [vmem:[%s4093_s1 + $0x98] sm:$0xff]   ;;  %v3104_v23 = vld [vmem:[%s4093_s1 + $0x90] sm:$0xff]  }
   0x9   :  { %2753 = vmatpush3.bf16.msra.mxu1 %v3088_v7  ;;  %v3105_v24 = vld [vmem:[%s4093_s1 + $0x48] sm:$0xff]   ;;  %v3109_v28 = vld [vmem:[%s4093_s1 + $0x40] sm:$0xff]   ;;  %v3115_v35 = vld [vmem:[%s4093_s1 + $0x178] sm:$0xff]  }
   0xa   :  { %2754 = vmatprep.subr.bf16.mxu1 %v3091_v10  ;;  %v3106_v25 = vld [vmem:[%s4093_s1 + $0x8] sm:$0xff]   ;;  %v3110_v29 = vld [vmem:[%s4093_s1] sm:$0xff]   ;;  %v3118_v39 = vld [vmem:[%s4093_s1 + $0x138] sm:$0xff]  }
   0xb   :  { %2733 = vmatpush3.bf16.msra.mxu0 %v3090_v9  ;;  %v3107_v26 = vld [vmem:[%s4093_s1 + $0xc8] sm:$0xff]   ;;  %v3111_v30 = vld [vmem:[%s4093_s1 + $0xc0] sm:$0xff]   ;;  %v3119_v40 = vld [vmem:[%s4093_s1 + $0x1f8] sm:$0xff]  }
   0xc   :  { %2734 = vmatprep.subr.bf16.mxu0 %v3093_v12  ;;  %v3108_v27 = vld [vmem:[%s4093_s1 + $0x88] sm:$0xff]   ;;  %v27_v31 = vld [vmem:[%s4094_s0] sm:$0xff]  ;;  %v3120_v41 = vld [vmem:[%s4093_s1 + $0x1b8] sm:$0xff]  }
   0xd   :  { %2755 = vmatpush3.bf16.msra.mxu1 %v3092_v11  ;;  %v2485_v32 = vcombine.low %v27_v31, %v27_v31  ;;  %v2486_v33 = vcombine.high %v27_v31, %v27_v31  ;;  %v3114_v34 = vld [vmem:[%s4093_s1 + $0x80] sm:$0xff]   ;;  %v28_v36 = vld [vmem:[%s4094_s0 + $0x8] sm:$0xff]  ;;  %v3121_v42 = vld [vmem:[%s4093_s1 + $0x170] sm:$0xff]  }
   0xe   :  { %2756 = vmatprep.subr.bf16.mxu1 %v3095_v14  ;;  %v2487_v37 = vcombine.low %v28_v36, %v28_v36  ;;  %v2488_v38 = vcombine.high %v28_v36, %v28_v36  ;;  %v3122_v43 = vld [vmem:[%s4093_s1 + $0x130] sm:$0xff]   ;;  %v3125_v46 = vld [vmem:[%s4093_s1 + $0x168] sm:$0xff]   ;;  %v3129_v50 = vld [vmem:[%s4093_s1 + $0x160] sm:$0xff]  }
   0xf   :  { %2735 = vmatpush3.bf16.msra.mxu0 %v3094_v13  ;;  %1767 = vmatprep.mubr.bf16.mxu0 %v2486_v33  ;;  %v3123_v44 = vld [vmem:[%s4093_s1 + $0x1f0] sm:$0xff]   ;;  %v3126_v47 = vld [vmem:[%s4093_s1 + $0x128] sm:$0xff]   ;;  %v3130_v51 = vld [vmem:[%s4093_s1 + $0x120] sm:$0xff]  }
  0x10   :  { %2736 = vmatprep.subr.bf16.mxu0 %v3097_v16  ;;  %1807 = vmatprep.mubr.bf16.mxu1 %v2488_v38  ;;  %v3124_v45 = vld [vmem:[%s4093_s1 + $0x1b0] sm:$0xff]   ;;  %v3127_v48 = vld [vmem:[%s4093_s1 + $0x1e8] sm:$0xff]   ;;  %v3131_v52 = vld [vmem:[%s4093_s1 + $0x1e0] sm:$0xff]  }
  0x11   :  { %2757 = vmatpush3.bf16.msra.mxu1 %v3096_v15  ;;  %v3128_v49 = vld [vmem:[%s4093_s1 + $0x1a8] sm:$0xff]   ;;  %v3132_v53 = vld [vmem:[%s4093_s1 + $0x1a0] sm:$0xff]   ;;  %v3133_v54 = vld [vmem:[%s4093_s1 + $0x158] sm:$0xff]  }
  0x12   :  { %2758 = vmatprep.subr.bf16.mxu1 %v3099_v18  ;;  %v3134_v55 = vld [vmem:[%s4093_s1 + $0x118] sm:$0xff]   ;;  %v3137_v58 = vld [vmem:[%s4093_s1 + $0x150] sm:$0xff]   ;;  %v3141_v62 = vld [vmem:[%s4093_s1 + $0x148] sm:$0xff]  }
  0x13   :  { %2737 = vmatpush3.bf16.msra.mxu0 %v3098_v17  ;;  %v3135_v56 = vld [vmem:[%s4093_s1 + $0x1d8] sm:$0xff]   ;;  %v3138_v59 = vld [vmem:[%s4093_s1 + $0x110] sm:$0xff]   ;;  %v3142_v63 = vld [vmem:[%s4093_s1 + $0x108] sm:$0xff]  }
  0x14   :  { %2738 = vmatprep.subr.bf16.mxu0 %v3101_v20  ;;  %v3136_v57 = vld [vmem:[%s4093_s1 + $0x198] sm:$0xff]   ;;  %v3139_v60 = vld [vmem:[%s4093_s1 + $0x1d0] sm:$0xff]   ;;  %v3143_v0 = vld [vmem:[%s4093_s1 + $0x1c8] sm:$0xff]  }
  0x15   :  { %2759 = vmatpush3.bf16.msra.mxu1 %v3100_v19  ;;  %v3140_v61 = vld [vmem:[%s4093_s1 + $0x190] sm:$0xff]   ;;  %v3144_v1 = vld [vmem:[%s4093_s1 + $0x188] sm:$0xff]   ;;  %v3145_v2 = vld [vmem:[%s4093_s1 + $0x140] sm:$0xff]  }
  0x16   :  { %2760 = vmatprep.subr.bf16.mxu1 %v3103_v22  ;;  %v3146_v3 = vld [vmem:[%s4093_s1 + $0x100] sm:$0xff]   ;;  %v29_v5 = vld [vmem:[%s4094_s0 + $0x10] sm:$0xff]  ;;  %v3151_v9 = vld [vmem:[%s4093_s1 + $0x278] sm:$0xff]  }
  0x17   :  { %2739 = vmatpush3.bf16.msra.mxu0 %v3102_v21  ;;  %v3147_v4 = vld [vmem:[%s4093_s1 + $0x1c0] sm:$0xff]   ;;  %v2489_v6 = vcombine.low %v29_v5, %v29_v5  ;;  %v2490_v7 = vcombine.high %v29_v5, %v29_v5  ;;  %v30_v10 = vld [vmem:[%s4094_s0 + $0x18] sm:$0xff]  ;;  %v3157_v16 = vld [vmem:[%s4093_s1 + $0x270] sm:$0xff]  }
  0x18   :  { %2740 = vmatprep.subr.bf16.mxu0 %v3105_v24  ;;  %v3150_v8 = vld [vmem:[%s4093_s1 + $0x180] sm:$0xff]   ;;  %v2491_v11 = vcombine.low %v30_v10, %v30_v10  ;;  %v2492_v12 = vcombine.high %v30_v10, %v30_v10  ;;  %v3154_v13 = vld [vmem:[%s4093_s1 + $0x238] sm:$0xff]   ;;  %v3158_v17 = vld [vmem:[%s4093_s1 + $0x230] sm:$0xff]  }
  0x19   :  { %2761 = vmatpush3.bf16.msra.mxu1 %v3104_v23  ;;  %v3155_v14 = vld [vmem:[%s4093_s1 + $0x2f8] sm:$0xff]   ;;  %v3159_v18 = vld [vmem:[%s4093_s1 + $0x2f0] sm:$0xff]   ;;  %v3161_v20 = vld [vmem:[%s4093_s1 + $0x268] sm:$0xff]  }
  0x1a   :  { %2762 = vmatprep.subr.bf16.mxu1 %v3107_v26  ;;  %v3156_v15 = vld [vmem:[%s4093_s1 + $0x2b8] sm:$0xff]   ;;  %v3160_v19 = vld [vmem:[%s4093_s1 + $0x2b0] sm:$0xff]   ;;  %v3162_v21 = vld [vmem:[%s4093_s1 + $0x228] sm:$0xff]  }
  0x1b   :  { %2741 = vmatpush3.bf16.msra.mxu0 %v3106_v25  ;;  %v3163_v22 = vld [vmem:[%s4093_s1 + $0x2e8] sm:$0xff]   ;;  %v3165_v24 = vld [vmem:[%s4093_s1 + $0x260] sm:$0xff]   ;;  %v3172_v31 = vld [vmem:[%s4093_s1 + $0x298] sm:$0xff]  }
  0x1c   :  { %2742 = vmatprep.subr.bf16.mxu0 %v3109_v28  ;;  %v3164_v23 = vld [vmem:[%s4093_s1 + $0x2a8] sm:$0xff]   ;;  %v3166_v25 = vld [vmem:[%s4093_s1 + $0x220] sm:$0xff]   ;;  %v3169_v28 = vld [vmem:[%s4093_s1 + $0x258] sm:$0xff]  }
  0x1d   :  { %2763 = vmatpush3.bf16.msra.mxu1 %v3108_v27  ;;  %v3167_v26 = vld [vmem:[%s4093_s1 + $0x2e0] sm:$0xff]   ;;  %v3174_v33 = vld [vmem:[%s4093_s1 + $0x210] sm:$0xff]   ;;  %v3177_v36 = vld [vmem:[%s4093_s1 + $0x248] sm:$0xff]  }
  0x1e   :  { %2764 = vmatprep.subr.bf16.mxu1 %v3111_v30  ;;  %v3168_v27 = vld [vmem:[%s4093_s1 + $0x2a0] sm:$0xff]   ;;  %v3171_v30 = vld [vmem:[%s4093_s1 + $0x2d8] sm:$0xff]   ;;  %v3179_v38 = vld [vmem:[%s4093_s1 + $0x2c8] sm:$0xff]  }
  0x1f   :  { %2743 = vmatpush3.bf16.msra.mxu0 %v3110_v29  ;;  %v3170_v29 = vld [vmem:[%s4093_s1 + $0x218] sm:$0xff]   ;;  %v3213_v10 = vld [vmem:[%s4093_s1 + $0x348] sm:$0xff]  }
  0x20   :  { %2772 = vmatprep.subr.bf16.mxu0 %v3115_v35  ;;  %v3176_v35 = vld [vmem:[%s4093_s1 + $0x290] sm:$0xff]   ;;  %v3208_v5 = vld [vmem:[%s4093_s1 + $0x398] sm:$0xff]  }
  0x21   :  { %2765 = vmatpush3.bf16.msra.mxu1 %v3114_v34  ;;  %v3175_v34 = vld [vmem:[%s4093_s1 + $0x2d0] sm:$0xff]  }
  0x22   :  { %1768 = vmatmul.mubr.bf16.vlgmr.msra.gmra.mxu0 %v2485_v32  ;;  %2794 = vmatprep.subr.bf16.mxu1 %v3119_v40  ;;  %v3173_v32 = vld [vmem:[%s4093_s1 + $0x250] sm:$0xff]   ;;  %v3181_v40 = vld [vmem:[%s4093_s1 + $0x240] sm:$0xff]  }
  0x23   :  { %2773 = vmatpush3.bf16.msra.mxu0 %v3118_v39  ;;  %1847 = vmatprep.mubr.bf16.mxu0 %v2490_v7  ;;  %v3180_v39 = vld [vmem:[%s4093_s1 + $0x288] sm:$0xff]   ;;  %v3210_v7 = vld [vmem:[%s4093_s1 + $0x310] sm:$0xff]  }
  0x24   :  { %1808 = vmatmul.mubr.bf16.vlgmr.msra.gmra.mxu1 %v2487_v37  ;;  %2774 = vmatprep.subr.bf16.mxu0 %v3121_v42  ;;  %v3178_v37 = vld [vmem:[%s4093_s1 + $0x208] sm:$0xff]   ;;  %v3183_v42 = vld [vmem:[%s4093_s1 + $0x2c0] sm:$0xff]  }
  0x25   :  { %2795 = vmatpush3.bf16.msra.mxu1 %v3120_v41  ;;  %1887 = vmatprep.mubr.bf16.mxu1 %v2492_v12  ;;  %v3182_v41 = vld [vmem:[%s4093_s1 + $0x200] sm:$0xff]   ;;  %v3215_v12 = vld [vmem:[%s4093_s1 + $0x3c8] sm:$0xff]  }
  0x26   :  { %2796 = vmatprep.subr.bf16.mxu1 %v3123_v44 }
  0x27   :  { %2775 = vmatpush3.bf16.msra.mxu0 %v3122_v43  ;;  %v31_v43 = vld [vmem:[%s4094_s0 + $0x20] sm:$0xff] }
  0x28   :  { %2776 = vmatprep.subr.bf16.mxu0 %v3125_v46  ;;  %v2493_v44 = vcombine.low %v31_v43, %v31_v43  ;;  %v3186_v46 = vld [vmem:[%s4093_s1 + $0x280] sm:$0xff]  }
  0x29   :  { %2797 = vmatpush3.bf16.msra.mxu1 %v3124_v45  ;;  %v2494_v45 = vcombine.high %v31_v43, %v31_v43  ;;  %v3244_v43 = vld [vmem:[%s4093_s1 + $0x498] sm:$0xff]  }
  0x2a   :  { %2798 = vmatprep.subr.bf16.mxu1 %v3127_v48  ;;  %v32_v48 = vld [vmem:[%s4094_s0 + $0x28] sm:$0xff] }
  0x2b   :  { %2777 = vmatpush3.bf16.msra.mxu0 %v3126_v47  ;;  %v3187_v47 = vld [vmem:[%s4093_s1 + $0x378] sm:$0xff]  }
  0x2c   :  { %2778 = vmatprep.subr.bf16.mxu0 %v3129_v50  ;;  %v2496_v50 = vcombine.high %v32_v48, %v32_v48 }
  0x2d   :  { %2799 = vmatpush3.bf16.msra.mxu1 %v3128_v49  ;;  %v2495_v49 = vcombine.low %v32_v48, %v32_v48  ;;  %v3249_v48 = vld [vmem:[%s4093_s1 + $0x448] sm:$0xff]  }
  0x2e   :  { %2800 = vmatprep.subr.bf16.mxu1 %v3131_v52  ;;  %v3191_v52 = vld [vmem:[%s4093_s1 + $0x3f8] sm:$0xff]  }
  0x2f   :  { %2779 = vmatpush3.bf16.msra.mxu0 %v3130_v51  ;;  %v3190_v51 = vld [vmem:[%s4093_s1 + $0x338] sm:$0xff]  }
  0x30   :  { %2780 = vmatprep.subr.bf16.mxu0 %v3133_v54  ;;  %v3193_v54 = vld [vmem:[%s4093_s1 + $0x370] sm:$0xff]  }
  0x31   :  { %2801 = vmatpush3.bf16.msra.mxu1 %v3132_v53  ;;  %v3192_v53 = vld [vmem:[%s4093_s1 + $0x3b8] sm:$0xff]  }
  0x32   :  { %2802 = vmatprep.subr.bf16.mxu1 %v3135_v56  ;;  %v3195_v56 = vld [vmem:[%s4093_s1 + $0x3f0] sm:$0xff]  }
  0x33   :  { %2781 = vmatpush3.bf16.msra.mxu0 %v3134_v55  ;;  %v3194_v55 = vld [vmem:[%s4093_s1 + $0x330] sm:$0xff]  }
  0x34   :  { %2782 = vmatprep.subr.bf16.mxu0 %v3137_v58  ;;  %v3197_v58 = vld [vmem:[%s4093_s1 + $0x368] sm:$0xff]  }
  0x35   :  { %2803 = vmatpush3.bf16.msra.mxu1 %v3136_v57  ;;  %v3196_v57 = vld [vmem:[%s4093_s1 + $0x3b0] sm:$0xff]  }
  0x36   :  { %2804 = vmatprep.subr.bf16.mxu1 %v3139_v60  ;;  %v3199_v60 = vld [vmem:[%s4093_s1 + $0x3e8] sm:$0xff]  }
  0x37   :  { %2783 = vmatpush3.bf16.msra.mxu0 %v3138_v59  ;;  %v3198_v59 = vld [vmem:[%s4093_s1 + $0x328] sm:$0xff]  }
  0x38   :  { %2784 = vmatprep.subr.bf16.mxu0 %v3141_v62  ;;  %v3201_v62 = vld [vmem:[%s4093_s1 + $0x360] sm:$0xff]  }
  0x39   :  { %2805 = vmatpush3.bf16.msra.mxu1 %v3140_v61  ;;  %v3200_v61 = vld [vmem:[%s4093_s1 + $0x3a8] sm:$0xff]  }
  0x3a   :  { %2806 = vmatprep.subr.bf16.mxu1 %v3143_v0  ;;  %v3203_v0 = vld [vmem:[%s4093_s1 + $0x3e0] sm:$0xff]  }
  0x3b   :  { %2785 = vmatpush3.bf16.msra.mxu0 %v3142_v63  ;;  %v3202_v63 = vld [vmem:[%s4093_s1 + $0x320] sm:$0xff]  }
  0x3c   :  { %2786 = vmatprep.subr.bf16.mxu0 %v3145_v2  ;;  %v3205_v2 = vld [vmem:[%s4093_s1 + $0x358] sm:$0xff]  }
  0x3d   :  { %2807 = vmatpush3.bf16.msra.mxu1 %v3144_v1  ;;  %v3204_v1 = vld [vmem:[%s4093_s1 + $0x3a0] sm:$0xff]  }
  0x3e   :  { %2808 = vmatprep.subr.bf16.mxu1 %v3147_v4  ;;  %v3207_v4 = vld [vmem:[%s4093_s1 + $0x3d8] sm:$0xff]  }
  0x3f   :  { %2787 = vmatpush3.bf16.msra.mxu0 %v3146_v3  ;;  %v3206_v3 = vld [vmem:[%s4093_s1 + $0x318] sm:$0xff]  }
  0x40   :  { %2816 = vmatprep.subr.bf16.mxu0 %v3151_v9  ;;  %v3212_v9 = vld [vmem:[%s4093_s1 + $0x390] sm:$0xff]  }
  0x41   :  { %2809 = vmatpush3.bf16.msra.mxu1 %v3150_v8  ;;  %v3211_v8 = vld [vmem:[%s4093_s1 + $0x3d0] sm:$0xff]  }
  0x42   :  { %1848 = vmatmul.mubr.bf16.vlgmr.msra.gmra.mxu0 %v2489_v6  ;;  %2838 = vmatprep.subr.bf16.mxu1 %v3155_v14  ;;  %v3209_v6 = vld [vmem:[%s4093_s1 + $0x350] sm:$0xff]   ;;  %v3217_v14 = vld [vmem:[%s4093_s1 + $0x340] sm:$0xff]  }
  0x43   :  { %2817 = vmatpush3.bf16.msra.mxu0 %v3154_v13  ;;  %1927 = vmatprep.mubr.bf16.mxu0 %v2494_v45  ;;  %v3216_v13 = vld [vmem:[%s4093_s1 + $0x388] sm:$0xff]   ;;  %v3246_v45 = vld [vmem:[%s4093_s1 + $0x410] sm:$0xff]  }
  0x44   :  { %1888 = vmatmul.mubr.bf16.vlgmr.msra.gmra.mxu1 %v2491_v11  ;;  %2818 = vmatprep.subr.bf16.mxu0 %v3157_v16  ;;  %v3214_v11 = vld [vmem:[%s4093_s1 + $0x308] sm:$0xff]   ;;  %v3219_v16 = vld [vmem:[%s4093_s1 + $0x3c0] sm:$0xff]  }
  0x45   :  { %2839 = vmatpush3.bf16.msra.mxu1 %v3156_v15  ;;  %1967 = vmatprep.mubr.bf16.mxu1 %v2496_v50  ;;  %v3218_v15 = vld [vmem:[%s4093_s1 + $0x300] sm:$0xff]   ;;  %v3251_v50 = vld [vmem:[%s4093_s1 + $0x4c8] sm:$0xff]  }
  0x46   :  { %2840 = vmatprep.subr.bf16.mxu1 %v3159_v18 }
  0x47   :  { %2819 = vmatpush3.bf16.msra.mxu0 %v3158_v17  ;;  %v33_v17 = vld [vmem:[%s4094_s0 + $0x30] sm:$0xff] }
  0x48   :  { %2820 = vmatprep.subr.bf16.mxu0 %v3161_v20  ;;  %v2497_v18 = vcombine.low %v33_v17, %v33_v17  ;;  %v3222_v20 = vld [vmem:[%s4093_s1 + $0x380] sm:$0xff]  }
  0x49   :  { %2841 = vmatpush3.bf16.msra.mxu1 %v3160_v19  ;;  %v2498_v19 = vcombine.high %v33_v17, %v33_v17  ;;  %v3280_v17 = vld [vmem:[%s4093_s1 + $0x598] sm:$0xff]  }
  0x4a   :  { %2842 = vmatprep.subr.bf16.mxu1 %v3163_v22  ;;  %v34_v22 = vld [vmem:[%s4094_s0 + $0x38] sm:$0xff] }
  0x4b   :  { %2821 = vmatpush3.bf16.msra.mxu0 %v3162_v21  ;;  %v3223_v21 = vld [vmem:[%s4093_s1 + $0x478] sm:$0xff]  }
  0x4c   :  { %2822 = vmatprep.subr.bf16.mxu0 %v3165_v24  ;;  %v2500_v24 = vcombine.high %v34_v22, %v34_v22 }
  0x4d   :  { %2843 = vmatpush3.bf16.msra.mxu1 %v3164_v23  ;;  %v2499_v23 = vcombine.low %v34_v22, %v34_v22  ;;  %v3285_v22 = vld [vmem:[%s4093_s1 + $0x548] sm:$0xff]  }
  0x4e   :  { %2844 = vmatprep.subr.bf16.mxu1 %v3167_v26  ;;  %v3227_v26 = vld [vmem:[%s4093_s1 + $0x4f8] sm:$0xff]  }
  0x4f   :  { %2823 = vmatpush3.bf16.msra.mxu0 %v3166_v25  ;;  %v3226_v25 = vld [vmem:[%s4093_s1 + $0x438] sm:$0xff]  }
  0x50   :  { %2824 = vmatprep.subr.bf16.mxu0 %v3169_v28  ;;  %v3229_v28 = vld [vmem:[%s4093_s1 + $0x470] sm:$0xff]  }
  0x51   :  { %2845 = vmatpush3.bf16.msra.mxu1 %v3168_v27  ;;  %v3228_v27 = vld [vmem:[%s4093_s1 + $0x4b8] sm:$0xff]  }
  0x52   :  { %2846 = vmatprep.subr.bf16.mxu1 %v3171_v30  ;;  %v3231_v30 = vld [vmem:[%s4093_s1 + $0x4f0] sm:$0xff]  }
  0x53   :  { %2825 = vmatpush3.bf16.msra.mxu0 %v3170_v29  ;;  %v3230_v29 = vld [vmem:[%s4093_s1 + $0x430] sm:$0xff]  }
  0x54   :  { %2826 = vmatprep.subr.bf16.mxu0 %v3173_v32  ;;  %v3233_v32 = vld [vmem:[%s4093_s1 + $0x468] sm:$0xff]  }
  0x55   :  { %2847 = vmatpush3.bf16.msra.mxu1 %v3172_v31  ;;  %v3232_v31 = vld [vmem:[%s4093_s1 + $0x4b0] sm:$0xff]  }
  0x56   :  { %2848 = vmatprep.subr.bf16.mxu1 %v3175_v34  ;;  %v3235_v34 = vld [vmem:[%s4093_s1 + $0x4e8] sm:$0xff]  }
  0x57   :  { %2827 = vmatpush3.bf16.msra.mxu0 %v3174_v33  ;;  %v3234_v33 = vld [vmem:[%s4093_s1 + $0x428] sm:$0xff]  }
  0x58   :  { %2828 = vmatprep.subr.bf16.mxu0 %v3177_v36  ;;  %v3237_v36 = vld [vmem:[%s4093_s1 + $0x460] sm:$0xff]  }
  0x59   :  { %2849 = vmatpush3.bf16.msra.mxu1 %v3176_v35  ;;  %v3236_v35 = vld [vmem:[%s4093_s1 + $0x4a8] sm:$0xff]  }
  0x5a   :  { %2850 = vmatprep.subr.bf16.mxu1 %v3179_v38  ;;  %v3239_v38 = vld [vmem:[%s4093_s1 + $0x4e0] sm:$0xff]  }
  0x5b   :  { %2829 = vmatpush3.bf16.msra.mxu0 %v3178_v37  ;;  %v3238_v37 = vld [vmem:[%s4093_s1 + $0x420] sm:$0xff]  }
  0x5c   :  { %2830 = vmatprep.subr.bf16.mxu0 %v3181_v40  ;;  %v3241_v40 = vld [vmem:[%s4093_s1 + $0x458] sm:$0xff]  }
  0x5d   :  { %2851 = vmatpush3.bf16.msra.mxu1 %v3180_v39  ;;  %v3240_v39 = vld [vmem:[%s4093_s1 + $0x4a0] sm:$0xff]  }
  0x5e   :  { %2852 = vmatprep.subr.bf16.mxu1 %v3183_v42  ;;  %v3243_v42 = vld [vmem:[%s4093_s1 + $0x4d8] sm:$0xff]  }
  0x5f   :  { %2831 = vmatpush3.bf16.msra.mxu0 %v3182_v41  ;;  %v3242_v41 = vld [vmem:[%s4093_s1 + $0x418] sm:$0xff]  }
  0x60   :  { %2860 = vmatprep.subr.bf16.mxu0 %v3187_v47  ;;  %v3248_v47 = vld [vmem:[%s4093_s1 + $0x490] sm:$0xff]  }
  0x61   :  { %2853 = vmatpush3.bf16.msra.mxu1 %v3186_v46  ;;  %v3247_v46 = vld [vmem:[%s4093_s1 + $0x4d0] sm:$0xff]  }
  0x62   :  { %1928 = vmatmul.mubr.bf16.vlgmr.msra.gmra.mxu0 %v2493_v44  ;;  %2882 = vmatprep.subr.bf16.mxu1 %v3191_v52  ;;  %v3245_v44 = vld [vmem:[%s4093_s1 + $0x450] sm:$0xff]   ;;  %v3253_v52 = vld [vmem:[%s4093_s1 + $0x440] sm:$0xff]  }
  0x63   :  { %2861 = vmatpush3.bf16.msra.mxu0 %v3190_v51  ;;  %2007 = vmatprep.mubr.bf16.mxu0 %v2498_v19  ;;  %v3252_v51 = vld [vmem:[%s4093_s1 + $0x488] sm:$0xff]   ;;  %v3282_v19 = vld [vmem:[%s4093_s1 + $0x510] sm:$0xff]  }
  0x64   :  { %1968 = vmatmul.mubr.bf16.vlgmr.msra.gmra.mxu1 %v2495_v49  ;;  %2862 = vmatprep.subr.bf16.mxu0 %v3193_v54  ;;  %v3250_v49 = vld [vmem:[%s4093_s1 + $0x408] sm:$0xff]   ;;  %v3255_v54 = vld [vmem:[%s4093_s1 + $0x4c0] sm:$0xff]  }
  0x65   :  { %2883 = vmatpush3.bf16.msra.mxu1 %v3192_v53  ;;  %2047 = vmatprep.mubr.bf16.mxu1 %v2500_v24  ;;  %v3254_v53 = vld [vmem:[%s4093_s1 + $0x400] sm:$0xff]   ;;  %v3287_v24 = vld [vmem:[%s4093_s1 + $0x5c8] sm:$0xff]  }
  0x66   :  { %2884 = vmatprep.subr.bf16.mxu1 %v3195_v56 }
  0x67   :  { %2863 = vmatpush3.bf16.msra.mxu0 %v3194_v55  ;;  %v35_v55 = vld [vmem:[%s4094_s0 + $0x40] sm:$0xff] }
  0x68   :  { %2864 = vmatprep.subr.bf16.mxu0 %v3197_v58  ;;  %v2501_v56 = vcombine.low %v35_v55, %v35_v55  ;;  %v3258_v58 = vld [vmem:[%s4093_s1 + $0x480] sm:$0xff]  }
  0x69   :  { %2885 = vmatpush3.bf16.msra.mxu1 %v3196_v57  ;;  %v2502_v57 = vcombine.high %v35_v55, %v35_v55 }
  0x6a   :  { %2886 = vmatprep.subr.bf16.mxu1 %v3199_v60  ;;  %v36_v60 = vld [vmem:[%s4094_s0 + $0x48] sm:$0xff] }
  0x6b   :  { %2865 = vmatpush3.bf16.msra.mxu0 %v3198_v59  ;;  %v3259_v59 = vld [vmem:[%s4093_s1 + $0x578] sm:$0xff]  }
  0x6c   :  { %2866 = vmatprep.subr.bf16.mxu0 %v3201_v62  ;;  %v2504_v62 = vcombine.high %v36_v60, %v36_v60 }
  0x6d   :  { %2887 = vmatpush3.bf16.msra.mxu1 %v3200_v61  ;;  %v2503_v61 = vcombine.low %v36_v60, %v36_v60 }
  0x6e   :  { %2888 = vmatprep.subr.bf16.mxu1 %v3203_v0  ;;  %v3263_v0 = vld [vmem:[%s4093_s1 + $0x5f8] sm:$0xff]  }
  0x6f   :  { %2867 = vmatpush3.bf16.msra.mxu0 %v3202_v63  ;;  %v3262_v63 = vld [vmem:[%s4093_s1 + $0x538] sm:$0xff]  }
  0x70   :  { %2868 = vmatprep.subr.bf16.mxu0 %v3205_v2  ;;  %v3265_v2 = vld [vmem:[%s4093_s1 + $0x570] sm:$0xff]  }
  0x71   :  { %2889 = vmatpush3.bf16.msra.mxu1 %v3204_v1  ;;  %v3264_v1 = vld [vmem:[%s4093_s1 + $0x5b8] sm:$0xff]  }
  0x72   :  { %2890 = vmatprep.subr.bf16.mxu1 %v3207_v4  ;;  %v3267_v4 = vld [vmem:[%s4093_s1 + $0x5f0] sm:$0xff]  }
  0x73   :  { %2869 = vmatpush3.bf16.msra.mxu0 %v3206_v3  ;;  %v3266_v3 = vld [vmem:[%s4093_s1 + $0x530] sm:$0xff]  }
  0x74   :  { %2870 = vmatprep.subr.bf16.mxu0 %v3209_v6  ;;  %v3269_v6 = vld [vmem:[%s4093_s1 + $0x568] sm:$0xff]  }
  0x75   :  { %2891 = vmatpush3.bf16.msra.mxu1 %v3208_v5  ;;  %v3268_v5 = vld [vmem:[%s4093_s1 + $0x5b0] sm:$0xff]  }
  0x76   :  { %2892 = vmatprep.subr.bf16.mxu1 %v3211_v8  ;;  %v3271_v8 = vld [vmem:[%s4093_s1 + $0x5e8] sm:$0xff]  }
  0x77   :  { %2871 = vmatpush3.bf16.msra.mxu0 %v3210_v7  ;;  %v3270_v7 = vld [vmem:[%s4093_s1 + $0x528] sm:$0xff]  }
  0x78   :  { %2872 = vmatprep.subr.bf16.mxu0 %v3213_v10  ;;  %v3273_v10 = vld [vmem:[%s4093_s1 + $0x560] sm:$0xff]  }
  0x79   :  { %2893 = vmatpush3.bf16.msra.mxu1 %v3212_v9  ;;  %v3272_v9 = vld [vmem:[%s4093_s1 + $0x5a8] sm:$0xff]  }
  0x7a   :  { %2894 = vmatprep.subr.bf16.mxu1 %v3215_v12  ;;  %v3275_v12 = vld [vmem:[%s4093_s1 + $0x5e0] sm:$0xff]  }
  0x7b   :  { %2873 = vmatpush3.bf16.msra.mxu0 %v3214_v11  ;;  %v3274_v11 = vld [vmem:[%s4093_s1 + $0x520] sm:$0xff]  }
  0x7c   :  { %2874 = vmatprep.subr.bf16.mxu0 %v3217_v14  ;;  %v3277_v14 = vld [vmem:[%s4093_s1 + $0x558] sm:$0xff]  }
  0x7d   :  { %2895 = vmatpush3.bf16.msra.mxu1 %v3216_v13  ;;  %v3276_v13 = vld [vmem:[%s4093_s1 + $0x5a0] sm:$0xff]  }
  0x7e   :  { %2896 = vmatprep.subr.bf16.mxu1 %v3219_v16  ;;  %v3279_v16 = vld [vmem:[%s4093_s1 + $0x5d8] sm:$0xff]  }
  0x7f   :  { %2875 = vmatpush3.bf16.msra.mxu0 %v3218_v15  ;;  %v3278_v15 = vld [vmem:[%s4093_s1 + $0x518] sm:$0xff]  }
  0x80   :  { %2904 = vmatprep.subr.bf16.mxu0 %v3223_v21  ;;  %v3284_v21 = vld [vmem:[%s4093_s1 + $0x590] sm:$0xff]  }
  0x81   :  { %2897 = vmatpush3.bf16.msra.mxu1 %v3222_v20  ;;  %v3283_v20 = vld [vmem:[%s4093_s1 + $0x5d0] sm:$0xff]  }
  0x82   :  { %2008 = vmatmul.mubr.bf16.vlgmr.msra.gmra.mxu0 %v2497_v18  ;;  %2926 = vmatprep.subr.bf16.mxu1 %v3227_v26  ;;  %v3281_v18 = vld [vmem:[%s4093_s1 + $0x550] sm:$0xff]   ;;  %v3289_v26 = vld [vmem:[%s4093_s1 + $0x540] sm:$0xff]  }
  0x83   :  { %2905 = vmatpush3.bf16.msra.mxu0 %v3226_v25  ;;  %2087 = vmatprep.mubr.bf16.mxu0 %v2502_v57  ;;  %v3288_v25 = vld [vmem:[%s4093_s1 + $0x588] sm:$0xff]  }
  0x84   :  { %2048 = vmatmul.mubr.bf16.vlgmr.msra.gmra.mxu1 %v2499_v23  ;;  %2906 = vmatprep.subr.bf16.mxu0 %v3229_v28  ;;  %v3286_v23 = vld [vmem:[%s4093_s1 + $0x508] sm:$0xff]   ;;  %v3291_v28 = vld [vmem:[%s4093_s1 + $0x5c0] sm:$0xff]  }
  0x85   :  { %2927 = vmatpush3.bf16.msra.mxu1 %v3228_v27  ;;  %2127 = vmatprep.mubr.bf16.mxu1 %v2504_v62  ;;  %v3290_v27 = vld [vmem:[%s4093_s1 + $0x500] sm:$0xff]  }
  0x86   :  { %2928 = vmatprep.subr.bf16.mxu1 %v3231_v30 }
  0x87   :  { %2907 = vmatpush3.bf16.msra.mxu0 %v3230_v29  ;;  %v37_v29 = vld [vmem:[%s4094_s0 + $0x50] sm:$0xff] }
  0x88   :  { %2908 = vmatprep.subr.bf16.mxu0 %v3233_v32  ;;  %v2505_v30 = vcombine.low %v37_v29, %v37_v29  ;;  %v3294_v32 = vld [vmem:[%s4093_s1 + $0x580] sm:$0xff]  }
  0x89   :  { %2929 = vmatpush3.bf16.msra.mxu1 %v3232_v31  ;;  %v2506_v31 = vcombine.high %v37_v29, %v37_v29  ;;  %v3316_v29 = vld [vmem:[%s4097_s5 + $0x28] sm:$0xff]  }
  0x8a   :  { %2930 = vmatprep.subr.bf16.mxu1 %v3235_v34  ;;  %v3322_v34 = vmov 0.0  }
  0x8b   :  { %2909 = vmatpush3.bf16.msra.mxu0 %v3234_v33  ;;  %v38_v33 = vld [vmem:[%s4094_s0 + $0x58] sm:$0xff] }
  0x8c   :  { %2910 = vmatprep.subr.bf16.mxu0 %v3237_v36  ;;  %v2508_v36 = vcombine.high %v38_v33, %v38_v33 }
  0x8d   :  { %2931 = vmatpush3.bf16.msra.mxu1 %v3236_v35  ;;  %v2507_v35 = vcombine.low %v38_v33, %v38_v33  ;;  %v3320_v33 = vld [vmem:[%s4097_s5 + $0x8] sm:$0xff]  }
  0x8e   :  { %2932 = vmatprep.subr.bf16.mxu1 %v3239_v38  ;;  %v3298_v38 = vld [vmem:[%s4093_s1 + $0x630] sm:$0xff]  }
  0x8f   :  { %2911 = vmatpush3.bf16.msra.mxu0 %v3238_v37  ;;  %v3297_v37 = vld [vmem:[%s4093_s1 + $0x638] sm:$0xff]  }
  0x90   :  { %2912 = vmatprep.subr.bf16.mxu0 %v3241_v40  ;;  %v3300_v40 = vld [vmem:[%s4093_s1 + $0x620] sm:$0xff]  }
  0x91   :  { %2933 = vmatpush3.bf16.msra.mxu1 %v3240_v39  ;;  %v3299_v39 = vld [vmem:[%s4093_s1 + $0x628] sm:$0xff]  }
  0x92   :  { %2934 = vmatprep.subr.bf16.mxu1 %v3243_v42  ;;  %v3302_v42 = vld [vmem:[%s4093_s1 + $0x610] sm:$0xff]  }
  0x93   :  { %2913 = vmatpush3.bf16.msra.mxu0 %v3242_v41  ;;  %v3301_v41 = vld [vmem:[%s4093_s1 + $0x618] sm:$0xff]  }
  0x94   :  { %2914 = vmatprep.subr.bf16.mxu0 %v3245_v44  ;;  %v3304_v44 = vld [vmem:[%s4093_s1 + $0x600] sm:$0xff]  }
  0x95   :  { %2935 = vmatpush3.bf16.msra.mxu1 %v3244_v43  ;;  %v3303_v43 = vld [vmem:[%s4093_s1 + $0x608] sm:$0xff]  }
  0x96   :  { %2936 = vmatprep.subr.bf16.mxu1 %v3247_v46 }
  0x97   :  { %2915 = vmatpush3.bf16.msra.mxu0 %v3246_v45  ;;  %v3305_v45 = vld [vmem:[%s4094_s0 + $0x60] ss:$0 sps:$4 sm:$0xff]  }
  0x98   :  { %2916 = vmatprep.subr.bf16.mxu0 %v3249_v48 }
  0x99   :  { %2937 = vmatpush3.bf16.msra.mxu1 %v3248_v47  ;;  %v2484_v47 = vld [vmem:[%s4095_s2] ss:$0 sm:$0xff] }
  0x9a   :  { %2938 = vmatprep.subr.bf16.mxu1 %v3251_v50 }
  0x9b   :  { %2917 = vmatpush3.bf16.msra.mxu0 %v3250_v49 }
  0x9c   :  { %2918 = vmatprep.subr.bf16.mxu0 %v3253_v52 }
  0x9d   :  { %2939 = vmatpush3.bf16.msra.mxu1 %v3252_v51 }
  0x9e   :  { %2940 = vmatprep.subr.bf16.mxu1 %v3255_v54 }
  0x9f   :  { %2919 = vmatpush3.bf16.msra.mxu0 %v3254_v53 }
  0xa0   :  { %2948 = vmatprep.subr.bf16.mxu0 %v3259_v59 }
  0xa1   :  { %2941 = vmatpush3.bf16.msra.mxu1 %v3258_v58 }
  0xa2   :  { %2088 = vmatmul.mubr.bf16.vlgmr.msra.gmra.mxu0 %v2501_v56  ;;  %2970 = vmatprep.subr.bf16.mxu1 %v3263_v0 }
  0xa3   :  { %2949 = vmatpush3.bf16.msra.mxu0 %v3262_v63  ;;  %2167 = vmatprep.mubr.bf16.mxu0 %v2506_v31  ;;  %v3318_v31 = vld [vmem:[%s4097_s5 + $0x18] sm:$0xff]  }
  0xa4   :  { %2128 = vmatmul.mubr.bf16.vlgmr.msra.gmra.mxu1 %v2503_v61  ;;  %2950 = vmatprep.subr.bf16.mxu0 %v3265_v2 }
  0xa5   :  { %2971 = vmatpush3.bf16.msra.mxu1 %v3264_v1  ;;  %2207 = vmatprep.mubr.bf16.mxu1 %v2508_v36 }
  0xa6   :  { %2972 = vmatprep.subr.bf16.mxu1 %v3267_v4 }
  0xa7   :  { %2951 = vmatpush3.bf16.msra.mxu0 %v3266_v3 }
  0xa8   :  { %2952 = vmatprep.subr.bf16.mxu0 %v3269_v6 }
  0xa9   :  { %2973 = vmatpush3.bf16.msra.mxu1 %v3268_v5  ;;  %v3306_v5 = vld [vmem:[%s4096_s3 + $0x38] sm:$0xff]  }
  0xaa   :  { %2974 = vmatprep.subr.bf16.mxu1 %v3271_v8  ;;  %v3307_v8 = vld [vmem:[%s4096_s3 + $0x30] sm:$0xff]  }
  0xab   :  { %2953 = vmatpush3.bf16.msra.mxu0 %v3270_v7 }
  0xac   :  { %2954 = vmatprep.subr.bf16.mxu0 %v3273_v10  ;;  %v3309_v10 = vld [vmem:[%s4096_s3 + $0x20] sm:$0xff]  }
  0xad   :  { %2975 = vmatpush3.bf16.msra.mxu1 %v3272_v9  ;;  %v3308_v9 = vld [vmem:[%s4096_s3 + $0x28] sm:$0xff]  }
  0xae   :  { %2976 = vmatprep.subr.bf16.mxu1 %v3275_v12  ;;  %v3311_v12 = vld [vmem:[%s4096_s3 + $0x10] sm:$0xff]  }
  0xaf   :  { %2955 = vmatpush3.bf16.msra.mxu0 %v3274_v11  ;;  %v3310_v11 = vld [vmem:[%s4096_s3 + $0x18] sm:$0xff]  }
  0xb0   :  { %2956 = vmatprep.subr.bf16.mxu0 %v3277_v14 }
  0xb1   :  { %2977 = vmatpush3.bf16.msra.mxu1 %v3276_v13  ;;  %v3312_v13 = vld [vmem:[%s4096_s3 + $0x8] sm:$0xff]  }
  0xb2   :  { %2978 = vmatprep.subr.bf16.mxu1 %v3279_v16 }
  0xb3   :  { %2957 = vmatpush3.bf16.msra.mxu0 %v3278_v15 }
  0xb4   :  { %2958 = vmatprep.subr.bf16.mxu0 %v3281_v18 }
  0xb5   :  { %2979 = vmatpush3.bf16.msra.mxu1 %v3280_v17  ;;  %v3313_v17 = vld [vmem:[%s4096_s3] sm:$0xff]  }
  0xb6   :  { %2980 = vmatprep.subr.bf16.mxu1 %v3283_v20 }
  0xb7   :  { %2959 = vmatpush3.bf16.msra.mxu0 %v3282_v19 }
  0xb8   :  { %2960 = vmatprep.subr.bf16.mxu0 %v3285_v22 }
  0xb9   :  { %2981 = vmatpush3.bf16.msra.mxu1 %v3284_v21 }
  0xba   :  { %2982 = vmatprep.subr.bf16.mxu1 %v3287_v24 }
  0xbb   :  { %2961 = vmatpush3.bf16.msra.mxu0 %v3286_v23 }
  0xbc   :  { %2962 = vmatprep.subr.bf16.mxu0 %v3289_v26 }
  0xbd   :  { %2983 = vmatpush3.bf16.msra.mxu1 %v3288_v25 }
  0xbe   :  { %2984 = vmatprep.subr.bf16.mxu1 %v3291_v28  ;;  %v3315_v28 = vld [vmem:[%s4097_s5 + $0x30] sm:$0xff]  }
  0xbf   :  { %2963 = vmatpush3.bf16.msra.mxu0 %v3290_v27  ;;  %v3314_v27 = vld [vmem:[%s4097_s5 + $0x38] sm:$0xff]  }
  0xc0   :  { %3019 = vmatprep.subr.bf16.mxu0 %v3322_v34 }
  0xc1   :  { %2985 = vmatpush3.bf16.msra.mxu1 %v3294_v32  ;;  %v3319_v32 = vld [vmem:[%s4097_s5 + $0x10] sm:$0xff]  }
  0xc2   :  { %2168 = vmatmul.mubr.bf16.vlgmr.msra.gmra.mxu0 %v2505_v30  ;;  %3039 = vmatprep.subr.bf16.mxu1 %v3322_v34  ;;  %v3317_v30 = vld [vmem:[%s4097_s5 + $0x20] sm:$0xff]  }
  0xc3   :  { %3020 = vmatpush3.bf16.msra.mxu0 %v3297_v37  ;;  %3035 = vmatprep.mubr.msk.bf16.mxu0 %vm3323_vm0, %v3322_v34 }
  0xc4   :  { %2208 = vmatmul.mubr.bf16.vlgmr.msra.gmra.mxu1 %v2507_v35  ;;  %3021 = vmatprep.subr.bf16.mxu0 %v3322_v34 }
  0xc5   :  { %3055 = vmatprep.mubr.msk.bf16.mxu1 %vm3323_vm0, %v3322_v34  ;;  %3040 = vmatpush3.bf16.msra.mxu1 %v3306_v5 }
  0xc6   :  { %3041 = vmatprep.subr.bf16.mxu1 %v3322_v34 }
  0xc7   :  { %3022 = vmatpush3.bf16.msra.mxu0 %v3298_v38 }
  0xc8   :  { %3023 = vmatprep.subr.bf16.mxu0 %v3322_v34 }
  0xc9   :  { %3042 = vmatpush3.bf16.msra.mxu1 %v3307_v8 }
  0xca   :  { %3043 = vmatprep.subr.bf16.mxu1 %v3322_v34 }
  0xcb   :  { %3024 = vmatpush3.bf16.msra.mxu0 %v3299_v39 }
  0xcc   :  { %3025 = vmatprep.subr.bf16.mxu0 %v3322_v34 }
  0xcd   :  { %3044 = vmatpush3.bf16.msra.mxu1 %v3308_v9 }
  0xce   :  { %3045 = vmatprep.subr.bf16.mxu1 %v3322_v34 }
  0xcf   :  { %3026 = vmatpush3.bf16.msra.mxu0 %v3300_v40 }
  0xd0   :  { %3027 = vmatprep.subr.bf16.mxu0 %v3322_v34 }
  0xd1   :  { %3046 = vmatpush3.bf16.msra.mxu1 %v3309_v10 }
  0xd2   :  { %3047 = vmatprep.subr.bf16.mxu1 %v3322_v34 }
  0xd3   :  { %3028 = vmatpush3.bf16.msra.mxu0 %v3301_v41 }
  0xd4   :  { %3029 = vmatprep.subr.bf16.mxu0 %v3322_v34 }
  0xd5   :  { %3048 = vmatpush3.bf16.msra.mxu1 %v3310_v11 }
  0xd6   :  { %3049 = vmatprep.subr.bf16.mxu1 %v3322_v34 }
  0xd7   :  { %3030 = vmatpush3.bf16.msra.mxu0 %v3302_v42 }
  0xd8   :  { %3031 = vmatprep.subr.bf16.mxu0 %v3322_v34 }
  0xd9   :  { %3050 = vmatpush3.bf16.msra.mxu1 %v3311_v12  ;;  %v3321_v12 = vld [vmem:[%s4097_s5] sm:$0xff]  }
  0xda   :  { %3051 = vmatprep.subr.bf16.mxu1 %v3322_v34 }
  0xdb   :  { %3032 = vmatpush3.bf16.msra.mxu0 %v3303_v43 }
  0xdc   :  { %3033 = vmatprep.subr.bf16.mxu0 %v3322_v34 }
  0xdd   :  { %3052 = vmatpush3.bf16.msra.mxu1 %v3312_v13  ;;  %v2710_v13 = vld [vmem:[%s4098_s4] ss:$0 sm:$0xff] }
  0xde   :  { %3053 = vmatprep.subr.bf16.mxu1 %v3322_v34 }
  0xdf   :  { %3034 = vmatpush3.bf16.msra.mxu0 %v3304_v44 }
  0xe0   :  { %3059 = vmatprep.subr.bf16.mxu0 %v3322_v34 }
  0xe1   :  { %3054 = vmatpush3.bf16.msra.mxu1 %v3313_v17 }
  0xe2   :  { %v2744_v46 = vpop.f32.mrf.mxu0  ;;  %3036 = vmatmul.mubr.bf16.vlgmr.msra.gmra.mxu0 %v3305_v45 }
  0xe3   :  { %3075 = vmatprep.mubr.msk.bf16.mxu0 %vm3323_vm0, %v3322_v34  ;;  %3060 = vmatpush3.bf16.msra.mxu0 %v3314_v27 }
  0xe4   :  { %v2745_v48 = vpop.f32.mrf.mxu0  ;;  %v2766_v49 = vpop.f32.mrf.mxu1  ;;  %3061 = vmatprep.subr.bf16.mxu0 %v3322_v34 }
  0xe5   :  { %v2746_v50 = vadd.f32 %v2745_v48, %v2744_v46 }
  0xe6   :  { %v2747_v51 = vpop.f32.mrf.mxu0  ;;  %v2767_v52 = vpop.f32.mrf.mxu1 }
  0xe7   :  { %v1770_v53 = vadd.f32 %v2746_v50, %v2484_v47  ;;  %v2768_v54 = vadd.f32 %v2767_v52, %v2766_v49  ;;  %3062 = vmatpush3.bf16.msra.mxu0 %v3315_v28 }
  0xe8   :  { %v2748_v55 = vpop.f32.mrf.mxu0  ;;  %v2769_v56 = vpop.f32.mrf.mxu1  ;;  %3063 = vmatprep.subr.bf16.mxu0 %v3322_v34 }
  0xe9   :  { %v1810_v57 = vadd.f32 %v2768_v54, %v1770_v53 }
  0xea   :  { %v2770_v58 = vpop.f32.mrf.mxu1 }
  0xeb   :  { %3064 = vmatpush3.bf16.msra.mxu0 %v3316_v29 }
  0xec   :  { %3065 = vmatprep.subr.bf16.mxu0 %v3322_v34 }
  0xef   :  { %3066 = vmatpush3.bf16.msra.mxu0 %v3317_v30 }
  0xf0   :  { %3067 = vmatprep.subr.bf16.mxu0 %v3322_v34 }
  0xf3   :  { %3068 = vmatpush3.bf16.msra.mxu0 %v3318_v31 }
  0xf4   :  { %3069 = vmatprep.subr.bf16.mxu0 %v3322_v34 }
  0xf7   :  { %3070 = vmatpush3.bf16.msra.mxu0 %v3319_v32 }
  0xf8   :  { %3071 = vmatprep.subr.bf16.mxu0 %v3322_v34 }
  0xfb   :  { %3072 = vmatpush3.bf16.msra.mxu0 %v3320_v33 }
  0xfc   :  { %3073 = vmatprep.subr.bf16.mxu0 %v3322_v34 }
  0xff   :  { %3074 = vmatpush3.bf16.msra.mxu0 %v3321_v12 }
 0x102   :  { %v2788_v59 = vpop.f32.mrf.mxu0 }
 0x104   :  { %v2789_v60 = vpop.f32.mrf.mxu0  ;;  %v2810_v62 = vpop.f32.mrf.mxu1 }
 0x105   :  { %v2790_v61 = vadd.f32 %v2789_v60, %v2788_v59 }
 0x106   :  { %v2791_v63 = vpop.f32.mrf.mxu0  ;;  %v2811_v1 = vpop.f32.mrf.mxu1 }
 0x107   :  { %v1850_v0 = vadd.f32 %v2790_v61, %v1810_v57  ;;  %v2812_v2 = vadd.f32 %v2811_v1, %v2810_v62 }
 0x108   :  { %v2792_v3 = vpop.f32.mrf.mxu0  ;;  %v2813_v4 = vpop.f32.mrf.mxu1 }
 0x109   :  { %v1890_v6 = vadd.f32 %v2812_v2, %v1850_v0 }
 0x10a   :  { %v2814_v7 = vpop.f32.mrf.mxu1 }
 0x122   :  { %v2832_v14 = vpop.f32.mrf.mxu0 }
 0x124   :  { %v2833_v15 = vpop.f32.mrf.mxu0  ;;  %v2854_v16 = vpop.f32.mrf.mxu1 }
 0x125   :  { %v2834_v18 = vadd.f32 %v2833_v15, %v2832_v14 }
 0x126   :  { %v2835_v19 = vpop.f32.mrf.mxu0  ;;  %v2855_v20 = vpop.f32.mrf.mxu1 }
 0x127   :  { %v1930_v21 = vadd.f32 %v2834_v18, %v1890_v6  ;;  %v2856_v22 = vadd.f32 %v2855_v20, %v2854_v16  ;;  %v2719_v20 = vld [vmem:[%s4099_s6] ss:$0 sm:$0xff] }
 0x128   :  { %v2836_v23 = vpop.f32.mrf.mxu0  ;;  %v2857_v24 = vpop.f32.mrf.mxu1 }
 0x129   :  { %v1970_v25 = vadd.f32 %v2856_v22, %v1930_v21 }
 0x12a   :  { %v2858_v26 = vpop.f32.mrf.mxu1 }
 0x142   :  { %v2876_v35 = vpop.f32.mrf.mxu0 }
 0x144   :  { %v2877_v36 = vpop.f32.mrf.mxu0  ;;  %v2898_v37 = vpop.f32.mrf.mxu1 }
 0x145   :  { %v2878_v38 = vadd.f32 %v2877_v36, %v2876_v35 }
 0x146   :  { %v2879_v39 = vpop.f32.mrf.mxu0  ;;  %v2899_v40 = vpop.f32.mrf.mxu1 }
 0x147   :  { %v2010_v41 = vadd.f32 %v2878_v38, %v1970_v25  ;;  %v2900_v42 = vadd.f32 %v2899_v40, %v2898_v37 }
 0x148   :  { %v2880_v43 = vpop.f32.mrf.mxu0  ;;  %v2901_v44 = vpop.f32.mrf.mxu1 }
 0x149   :  { %v2050_v45 = vadd.f32 %v2900_v42, %v2010_v41 }
 0x14a   :  { %v2902_v46 = vpop.f32.mrf.mxu1 }
 0x162   :  { %v2920_v47 = vpop.f32.mrf.mxu0 }
 0x164   :  { %v2921_v48 = vpop.f32.mrf.mxu0  ;;  %v2942_v49 = vpop.f32.mrf.mxu1 }
 0x165   :  { %v2922_v62 = vadd.f32 %v2921_v48, %v2920_v47 }
 0x166   :  { %v2923_v50 = vpop.f32.mrf.mxu0  ;;  %v2943_v51 = vpop.f32.mrf.mxu1 }
 0x167   :  { %v2090_v63 = vadd.f32 %v2922_v62, %v2050_v45  ;;  %v2944_v0 = vadd.f32 %v2943_v51, %v2942_v49 }
 0x168   :  { %v2924_v52 = vpop.f32.mrf.mxu0  ;;  %v2945_v53 = vpop.f32.mrf.mxu1 }
 0x169   :  { %v2130_v2 = vadd.f32 %v2944_v0, %v2090_v63 }
 0x16a   :  { %v2946_v54 = vpop.f32.mrf.mxu1 }
 0x182   :  { %v2964_v55 = vpop.f32.mrf.mxu0 }
 0x184   :  { %v2965_v56 = vpop.f32.mrf.mxu0  ;;  %v2986_v57 = vpop.f32.mrf.mxu1 }
 0x185   :  { %v2966_v1 = vadd.f32 %v2965_v56, %v2964_v55 }
 0x186   :  { %v2967_v34 = vpop.f32.mrf.mxu0  ;;  %v2987_v58 = vpop.f32.mrf.mxu1 }
 0x187   :  { %v2170_v3 = vadd.f32 %v2966_v1, %v2130_v2  ;;  %v2988_v4 = vadd.f32 %v2987_v58, %v2986_v57 }
 0x188   :  { %v2968_v59 = vpop.f32.mrf.mxu0  ;;  %v2989_v60 = vpop.f32.mrf.mxu1 }
 0x189   :  { %v2210_v5 = vadd.f32 %v2988_v4, %v2170_v3 }
 0x18a   :  { %v2990_v61 = vpop.f32.mrf.mxu1 }
 0x1a2   :  { %v2249_v6 = vpop.f32.mrf.mxu0 }
 0x1a3   :  { %v2250_v7 = vadd.f32 %v2249_v6, %v2210_v5 }
 0x1a4   :  { %v3037_v8 = vpop.f32.mrf.mxu0 }
 0x1a5   :  { %v2255_v9 = vpack.c.bf16 %v2250_v7, %v2250_v7 }
 0x1a6   :  { %v2252_v10 = vpop.f32.mrf.mxu0 }
 0x1a7   :  { %3056 = vmatmul.mubr.bf16.vlgmr.msra.gmra.mxu1 %v2255_v9 }
 0x1a8   :  { %v3038_v11 = vpop.f32.mrf.mxu0 }
 0x267   :  { %v2361_v14 = vpop.f32.mrf.mxu1 }
 0x268   :  { %v2362_v15 = vadd.f32 %v2710_v13, %v2361_v14 }
 0x269   :  { %v3057_v16 = vpop.f32.mrf.mxu1 }
 0x26a   :  { %v2367_v17 = vpack.c.bf16 %v2362_v15, %v2362_v15 }
 0x26b   :  { %v2364_v18 = vpop.f32.mrf.mxu1 }
 0x26c   :  { %3076 = vmatmul.mubr.bf16.vlgmr.msra.gmra.mxu0 %v2367_v17 }
 0x26d   :  { %v3058_v19 = vpop.f32.mrf.mxu1 }
 0x32c   :  { %v2473_v21 = vpop.f32.mrf.mxu0 }
 0x32d   :  { %v2474_v22 = vadd.f32 %v2719_v20, %v2473_v21 }
 0x32e   :  { %v3077_v23 = vpop.f32.mrf.mxu0 }
 0x32f   :  { %2479 = vst [vmem:[%s4100_s7] sm:$0xff] %v2474_v22 }
 0x330   :  { %v2476_v24 = vpop.f32.mrf.mxu0 }
 0x332   :  { %v3078_v25 = vpop.f32.mrf.mxu0 }

</bundles_post_ra>
